<compile_context>
chip_gen: v7x
topology: tpu7x:2x2x1
jax: 0.10.0
libtpu: 0.0.40
codegen_flags: <defaults>
</compile_context>

<pallas_src>
import jax
import jax.numpy as jnp
from jax.experimental import pallas as pl
from jax.experimental.pallas import tpu as pltpu


def dwconv_kernel(x_ref, w_ref, b_ref, o_ref, xpad_ref):
    """One (channel-block, batch) grid step: full-plane depthwise 3x3 conv.

    x_ref:    (H, W, Cb)      input slab, channels on lanes
    w_ref:    (3, 3, Cb)      per-channel filter taps
    b_ref:    (1, Cb)         per-channel bias
    o_ref:    (H, W, Cb)      output slab
    xpad_ref: (H+2, W+2, Cb)  VMEM scratch holding the zero-padded slab
    """
    H, W, Cb = o_ref.shape
    dt = x_ref.dtype

    # --- Build the halo'd input in VMEM. ---
    # Zero only the 4 thin halo strips every step (cheap; the interior is fully
    # overwritten below).  Zeroing per step — not behind a program_id==0 guard —
    # stays correct under "parallel" megacore sharding where each TensorCore
    # owns its own scratch instance.
    zrow = jnp.zeros((1, W + 2, Cb), dt)
    xpad_ref[pl.ds(0, 1), :, :] = zrow
    xpad_ref[pl.ds(H + 1, 1), :, :] = zrow
    zcol = jnp.zeros((H, 1, Cb), dt)
    xpad_ref[pl.ds(1, H), pl.ds(0, 1), :] = zcol
    xpad_ref[pl.ds(1, H), pl.ds(W + 1, 1), :] = zcol
    # Interior copy (sublane offset 1; channels stay on the lane axis).
    xpad_ref[pl.ds(1, H), pl.ds(1, W), :] = x_ref[...]

    # bf16 activations/weights multiply natively on v6e/v7x VALUs; accumulate f32.
    mul_dtype = dt
    w = w_ref[...].astype(mul_dtype)                 # (3, 3, Cb)
    bias = b_ref[0, :].astype(jnp.float32)           # (Cb,)

    # 9 shifted multiply-accumulates, fully unrolled (pure VPU hot path).
    # The bias is folded into the first tap's add: no zero-init pass and no
    # trailing bias-add pass over the slab.
    acc = None
    for kh in range(3):
        for kw in range(3):
            tap = xpad_ref[pl.ds(kh, H), pl.ds(kw, W), :]
            contrib = (w[kh, kw, :] * tap).astype(jnp.float32)
            acc = (contrib + bias) if acc is None else (acc + contrib)

    o_ref[...] = acc.astype(o_ref.dtype)


def _pick_channel_block(Cp, H, W, itemsize, budget_bytes=20 * 1024 * 1024):
    """Largest lane-dense Cb whose per-step VMEM footprint fits the budget.

    Footprint per step ~ 2x input buf + 2x output buf + padded scratch.
    """
    for cb in (512, 384, 256, 128):
        if Cp % cb == 0:
            footprint = itemsize * cb * (4 * H * W + (H + 2) * (W + 2))
            if footprint <= budget_bytes:
                return cb
    # TODO(synk): if even Cb=128 exceeds the budget (very large H*W), tile H
    # into overlapping row strips instead of just accepting the big slab.
    return 128 if Cp % 128 == 0 else Cp


def dwconv(x, weight, bias):
    """Depthwise 3x3 conv, stride 1, padding 1, groups=C, with bias.

    x:      (B, C, H, W)   (PyTorch NCHW)
    weight: (C, 1, 3, 3)   (PyTorch depthwise conv weight layout)
    bias:   (C,)
    returns (B, C, H, W)
    """
    B, C, H, W = x.shape

    # Layout plumbing: channels onto the 128-lane axis; pad C to a multiple of
    # 128 so output stores are unmasked and lane-dense.
    Cp = C if C % 128 == 0 else ((C + 127) // 128) * 128
    x_nhwc = jnp.transpose(x, (0, 2, 3, 1))                    # (B, H, W, C)
    w_t = jnp.transpose(weight.reshape(C, 3, 3), (1, 2, 0))    # (3, 3, C)
    b_t = bias.reshape(1, C)                                   # (1, C)
    if Cp != C:
        pad = Cp - C
        x_nhwc = jnp.pad(x_nhwc, ((0, 0), (0, 0), (0, 0), (0, pad)))
        w_t = jnp.pad(w_t, ((0, 0), (0, 0), (0, pad)))
        b_t = jnp.pad(b_t, ((0, 0), (0, pad)))

    Cb = _pick_channel_block(Cp, H, W, x.dtype.itemsize)
    nc = Cp // Cb
    # Grid (channel-blocks, batch): weight/bias index only the outer axis, so
    # the pipeliner keeps them resident across the inner (batch) steps.
    grid = (nc, B)

    footprint = x.dtype.itemsize * Cb * (4 * H * W + (H + 2) * (W + 2))
    vmem_limit = min(64 * 1024 * 1024,
                     max(32 * 1024 * 1024, int(footprint * 3 // 2)))

    out_nhwc = pl.pallas_call(
        dwconv_kernel,
        out_shape=jax.ShapeDtypeStruct((B, H, W, Cp), x.dtype),
        grid_spec=pltpu.PrefetchScalarGridSpec(
            num_scalar_prefetch=0,
            grid=grid,
            in_specs=[
                pl.BlockSpec((None, H, W, Cb), lambda ci, bi: (bi, 0, 0, ci)),
                pl.BlockSpec((3, 3, Cb), lambda ci, bi: (0, 0, ci)),
                pl.BlockSpec((1, Cb), lambda ci, bi: (0, ci)),
            ],
            out_specs=pl.BlockSpec((None, H, W, Cb),
                                   lambda ci, bi: (bi, 0, 0, ci)),
            scratch_shapes=[pltpu.VMEM((H + 2, W + 2, Cb), x.dtype)],
        ),
        compiler_params=pltpu.CompilerParams(
            dimension_semantics=("parallel", "parallel"),
            vmem_limit_bytes=vmem_limit,
        ),
    )(x_nhwc, w_t, b_t)

    out = jnp.transpose(out_nhwc, (0, 3, 1, 2))                # back to NCHW
    if Cp != C:
        out = out[:, :C]
    return out


def dwconv_ref(x, weight, bias):
    # Pure-JAX reference: grouped conv with feature_group_count = C.
    C = x.shape[1]
    out = jax.lax.conv_general_dilated(
        x, weight,
        window_strides=(1, 1),
        padding=((1, 1), (1, 1)),
        dimension_numbers=("NCHW", "OIHW", "NCHW"),
        feature_group_count=C,
    )
    return out + bias.reshape(1, C, 1, 1)


if __name__ == "__main__":
    key = jax.random.PRNGKey(0)
    kx, kw, kb = jax.random.split(key, 3)

    B, C, H, W = 2, 4, 16, 16  # small shapes; C plays the role of `dim`
    x = jax.random.normal(kx, (B, C, H, W), dtype=jnp.float32)
    weight = jax.random.normal(kw, (C, 1, 3, 3), dtype=jnp.float32) * 0.1
    bias = jax.random.normal(kb, (C,), dtype=jnp.float32) * 0.1

    out = dwconv(x, weight, bias)
    out = jax.block_until_ready(out)

    ref = dwconv_ref(x, weight, bias)
    assert out.shape == (B, C, H, W)
    assert jnp.allclose(out, ref, atol=1e-5, rtol=1e-5)

    print("KERNEL_OK")
</pallas_src>

<mosaic_0001>
module attributes {stable_mosaic.version = 11 : i64} {
  func.func @dwconv_kernel(%arg0: i32, %arg1: i32, %arg2: memref<1x16x16x128xf32, #tpu.memory_space<vmem>>, %arg3: memref<3x3x128xf32, #tpu.memory_space<vmem>>, %arg4: memref<1x128xf32, #tpu.memory_space<vmem>>, %arg5: memref<1x16x16x128xf32, #tpu.memory_space<vmem>>, %arg6: memref<18x18x128xf32, #tpu.memory_space<vmem>>) attributes {dimension_semantics = [#tpu.dimension_semantics<parallel>, #tpu.dimension_semantics<parallel>], iteration_bounds = array<i64: 1, 2>, scalar_prefetch = 0 : i64, scratch_operands = 1 : i64, tpu.core_type = #tpu.core_type<tc>, window_params = [{transform_indices = @transform_0, window_bounds = array<i64: 1, 16, 16, 128>}, {transform_indices = @transform_1, window_bounds = array<i64: 3, 3, 128>}, {transform_indices = @transform_2, window_bounds = array<i64: 1, 128>}, {transform_indices = @transform_3, window_bounds = array<i64: 1, 16, 16, 128>}]} {
    %cst = arith.constant 0.000000e+00 : f32
    %0 = vector.broadcast %cst : f32 to vector<1x18x128xf32>
    %c0 = arith.constant 0 : index
    %c0_0 = arith.constant 0 : index
    %c0_1 = arith.constant 0 : index
    %1 = vector.load %arg6[%c0, %c0_0, %c0_1] : memref<18x18x128xf32, #tpu.memory_space<vmem>>, vector<1x18x128xf32>
    tpu.vector_store %arg6[%c0, %c0_0, %c0_1], %0 {strides = array<i32>} : memref<18x18x128xf32, #tpu.memory_space<vmem>>, vector<1x18x128xf32>,
    %c17 = arith.constant 17 : index
    %c0_2 = arith.constant 0 : index
    %c0_3 = arith.constant 0 : index
    %2 = vector.load %arg6[%c17, %c0_2, %c0_3] : memref<18x18x128xf32, #tpu.memory_space<vmem>>, vector<1x18x128xf32>
    tpu.vector_store %arg6[%c17, %c0_2, %c0_3], %0 {strides = array<i32>} : memref<18x18x128xf32, #tpu.memory_space<vmem>>, vector<1x18x128xf32>,
    %cst_4 = arith.constant 0.000000e+00 : f32
    %3 = vector.broadcast %cst_4 : f32 to vector<16x1x128xf32>
    %c1 = arith.constant 1 : index
    %c0_5 = arith.constant 0 : index
    %c0_6 = arith.constant 0 : index
    %4 = vector.load %arg6[%c1, %c0_5, %c0_6] : memref<18x18x128xf32, #tpu.memory_space<vmem>>, vector<16x1x128xf32>
    tpu.vector_store %arg6[%c1, %c0_5, %c0_6], %3 {strides = array<i32>} : memref<18x18x128xf32, #tpu.memory_space<vmem>>, vector<16x1x128xf32>,
    %c1_7 = arith.constant 1 : index
    %c17_8 = arith.constant 17 : index
    %c0_9 = arith.constant 0 : index
    %5 = vector.load %arg6[%c1_7, %c17_8, %c0_9] : memref<18x18x128xf32, #tpu.memory_space<vmem>>, vector<16x1x128xf32>
    tpu.vector_store %arg6[%c1_7, %c17_8, %c0_9], %3 {strides = array<i32>} : memref<18x18x128xf32, #tpu.memory_space<vmem>>, vector<16x1x128xf32>,
    %c0_10 = arith.constant 0 : index
    %c0_11 = arith.constant 0 : index
    %c0_12 = arith.constant 0 : index
    %c0_13 = arith.constant 0 : index
    %6 = vector.load %arg2[%c0_10, %c0_11, %c0_12, %c0_13] : memref<1x16x16x128xf32, #tpu.memory_space<vmem>>, vector<1x16x16x128xf32>
    %7 = vector.shape_cast %6 : vector<1x16x16x128xf32> to vector<16x16x128xf32>
    %c1_14 = arith.constant 1 : index
    %c1_15 = arith.constant 1 : index
    %c0_16 = arith.constant 0 : index
    %8 = vector.load %arg6[%c1_14, %c1_15, %c0_16] : memref<18x18x128xf32, #tpu.memory_space<vmem>>, vector<16x16x128xf32>
    tpu.vector_store %arg6[%c1_14, %c1_15, %c0_16], %7 {strides = array<i32>} : memref<18x18x128xf32, #tpu.memory_space<vmem>>, vector<16x16x128xf32>,
    %c0_17 = arith.constant 0 : index
    %c0_18 = arith.constant 0 : index
    %c0_19 = arith.constant 0 : index
    %9 = vector.load %arg3[%c0_17, %c0_18, %c0_19] : memref<3x3x128xf32, #tpu.memory_space<vmem>>, vector<3x3x128xf32>
    %c0_20 = arith.constant 0 : index
    %c0_21 = arith.constant 0 : index
    %10 = vector.load %arg4[%c0_20, %c0_21] : memref<1x128xf32, #tpu.memory_space<vmem>>, vector<1x128xf32>
    %11 = vector.shape_cast %10 : vector<1x128xf32> to vector<128xf32>
    %c0_22 = arith.constant 0 : index
    %c0_23 = arith.constant 0 : index
    %c0_24 = arith.constant 0 : index
    %12 = vector.load %arg6[%c0_22, %c0_23, %c0_24] : memref<18x18x128xf32, #tpu.memory_space<vmem>>, vector<16x16x128xf32>
    %13 = vector.extract_strided_slice %9 {offsets = [0, 0, 0], sizes = [1, 1, 128], strides = [1, 1, 1]} : vector<3x3x128xf32> to vector<1x1x128xf32>
    %14 = vector.shape_cast %13 : vector<1x1x128xf32> to vector<128xf32>
    %15 = vector.shape_cast %14 : vector<128xf32> to vector<1x1x128xf32>
    %16 = vector.broadcast %15 : vector<1x1x128xf32> to vector<16x16x128xf32>
    %17 = arith.mulf %16, %12 : vector<16x16x128xf32>
    %18 = vector.shape_cast %11 : vector<128xf32> to vector<1x1x128xf32>
    %19 = vector.broadcast %18 : vector<1x1x128xf32> to vector<16x16x128xf32>
    %20 = arith.addf %17, %19 : vector<16x16x128xf32>
    %c0_25 = arith.constant 0 : index
    %c1_26 = arith.constant 1 : index
    %c0_27 = arith.constant 0 : index
    %21 = vector.load %arg6[%c0_25, %c1_26, %c0_27] : memref<18x18x128xf32, #tpu.memory_space<vmem>>, vector<16x16x128xf32>
    %22 = vector.extract_strided_slice %9 {offsets = [0, 1, 0], sizes = [1, 1, 128], strides = [1, 1, 1]} : vector<3x3x128xf32> to vector<1x1x128xf32>
    %23 = vector.shape_cast %22 : vector<1x1x128xf32> to vector<128xf32>
    %24 = vector.shape_cast %23 : vector<128xf32> to vector<1x1x128xf32>
    %25 = vector.broadcast %24 : vector<1x1x128xf32> to vector<16x16x128xf32>
    %26 = arith.mulf %25, %21 : vector<16x16x128xf32>
    %27 = arith.addf %20, %26 : vector<16x16x128xf32>
    %c0_28 = arith.constant 0 : index
    %c2 = arith.constant 2 : index
    %c0_29 = arith.constant 0 : index
    %28 = vector.load %arg6[%c0_28, %c2, %c0_29] : memref<18x18x128xf32, #tpu.memory_space<vmem>>, vector<16x16x128xf32>
    %29 = vector.extract_strided_slice %9 {offsets = [0, 2, 0], sizes = [1, 1, 128], strides = [1, 1, 1]} : vector<3x3x128xf32> to vector<1x1x128xf32>
    %30 = vector.shape_cast %29 : vector<1x1x128xf32> to vector<128xf32>
    %31 = vector.shape_cast %30 : vector<128xf32> to vector<1x1x128xf32>
    %32 = vector.broadcast %31 : vector<1x1x128xf32> to vector<16x16x128xf32>
    %33 = arith.mulf %32, %28 : vector<16x16x128xf32>
    %34 = arith.addf %27, %33 : vector<16x16x128xf32>
    %c1_30 = arith.constant 1 : index
    %c0_31 = arith.constant 0 : index
    %c0_32 = arith.constant 0 : index
    %35 = vector.load %arg6[%c1_30, %c0_31, %c0_32] : memref<18x18x128xf32, #tpu.memory_space<vmem>>, vector<16x16x128xf32>
    %36 = vector.extract_strided_slice %9 {offsets = [1, 0, 0], sizes = [1, 1, 128], strides = [1, 1, 1]} : vector<3x3x128xf32> to vector<1x1x128xf32>
    %37 = vector.shape_cast %36 : vector<1x1x128xf32> to vector<128xf32>
    %38 = vector.shape_cast %37 : vector<128xf32> to vector<1x1x128xf32>
    %39 = vector.broadcast %38 : vector<1x1x128xf32> to vector<16x16x128xf32>
    %40 = arith.mulf %39, %35 : vector<16x16x128xf32>
    %41 = arith.addf %34, %40 : vector<16x16x128xf32>
    %c1_33 = arith.constant 1 : index
    %c1_34 = arith.constant 1 : index
    %c0_35 = arith.constant 0 : index
    %42 = vector.load %arg6[%c1_33, %c1_34, %c0_35] : memref<18x18x128xf32, #tpu.memory_space<vmem>>, vector<16x16x128xf32>
    %43 = vector.extract_strided_slice %9 {offsets = [1, 1, 0], sizes = [1, 1, 128], strides = [1, 1, 1]} : vector<3x3x128xf32> to vector<1x1x128xf32>
    %44 = vector.shape_cast %43 : vector<1x1x128xf32> to vector<128xf32>
    %45 = vector.shape_cast %44 : vector<128xf32> to vector<1x1x128xf32>
    %46 = vector.broadcast %45 : vector<1x1x128xf32> to vector<16x16x128xf32>
    %47 = arith.mulf %46, %42 : vector<16x16x128xf32>
    %48 = arith.addf %41, %47 : vector<16x16x128xf32>
    %c1_36 = arith.constant 1 : index
    %c2_37 = arith.constant 2 : index
    %c0_38 = arith.constant 0 : index
    %49 = vector.load %arg6[%c1_36, %c2_37, %c0_38] : memref<18x18x128xf32, #tpu.memory_space<vmem>>, vector<16x16x128xf32>
    %50 = vector.extract_strided_slice %9 {offsets = [1, 2, 0], sizes = [1, 1, 128], strides = [1, 1, 1]} : vector<3x3x128xf32> to vector<1x1x128xf32>
    %51 = vector.shape_cast %50 : vector<1x1x128xf32> to vector<128xf32>
    %52 = vector.shape_cast %51 : vector<128xf32> to vector<1x1x128xf32>
    %53 = vector.broadcast %52 : vector<1x1x128xf32> to vector<16x16x128xf32>
    %54 = arith.mulf %53, %49 : vector<16x16x128xf32>
    %55 = arith.addf %48, %54 : vector<16x16x128xf32>
    %c2_39 = arith.constant 2 : index
    %c0_40 = arith.constant 0 : index
    %c0_41 = arith.constant 0 : index
    %56 = vector.load %arg6[%c2_39, %c0_40, %c0_41] : memref<18x18x128xf32, #tpu.memory_space<vmem>>, vector<16x16x128xf32>
    %57 = vector.extract_strided_slice %9 {offsets = [2, 0, 0], sizes = [1, 1, 128], strides = [1, 1, 1]} : vector<3x3x128xf32> to vector<1x1x128xf32>
    %58 = vector.shape_cast %57 : vector<1x1x128xf32> to vector<128xf32>
    %59 = vector.shape_cast %58 : vector<128xf32> to vector<1x1x128xf32>
    %60 = vector.broadcast %59 : vector<1x1x128xf32> to vector<16x16x128xf32>
    %61 = arith.mulf %60, %56 : vector<16x16x128xf32>
    %62 = arith.addf %55, %61 : vector<16x16x128xf32>
    %c2_42 = arith.constant 2 : index
    %c1_43 = arith.constant 1 : index
    %c0_44 = arith.constant 0 : index
    %63 = vector.load %arg6[%c2_42, %c1_43, %c0_44] : memref<18x18x128xf32, #tpu.memory_space<vmem>>, vector<16x16x128xf32>
    %64 = vector.extract_strided_slice %9 {offsets = [2, 1, 0], sizes = [1, 1, 128], strides = [1, 1, 1]} : vector<3x3x128xf32> to vector<1x1x128xf32>
    %65 = vector.shape_cast %64 : vector<1x1x128xf32> to vector<128xf32>
    %66 = vector.shape_cast %65 : vector<128xf32> to vector<1x1x128xf32>
    %67 = vector.broadcast %66 : vector<1x1x128xf32> to vector<16x16x128xf32>
    %68 = arith.mulf %67, %63 : vector<16x16x128xf32>
    %69 = arith.addf %62, %68 : vector<16x16x128xf32>
    %c2_45 = arith.constant 2 : index
    %c2_46 = arith.constant 2 : index
    %c0_47 = arith.constant 0 : index
    %70 = vector.load %arg6[%c2_45, %c2_46, %c0_47] : memref<18x18x128xf32, #tpu.memory_space<vmem>>, vector<16x16x128xf32>
    %71 = vector.extract_strided_slice %9 {offsets = [2, 2, 0], sizes = [1, 1, 128], strides = [1, 1, 1]} : vector<3x3x128xf32> to vector<1x1x128xf32>
    %72 = vector.shape_cast %71 : vector<1x1x128xf32> to vector<128xf32>
    %73 = vector.shape_cast %72 : vector<128xf32> to vector<1x1x128xf32>
    %74 = vector.broadcast %73 : vector<1x1x128xf32> to vector<16x16x128xf32>
    %75 = arith.mulf %74, %70 : vector<16x16x128xf32>
    %76 = arith.addf %69, %75 : vector<16x16x128xf32>
    %c0_48 = arith.constant 0 : index
    %c0_49 = arith.constant 0 : index
    %c0_50 = arith.constant 0 : index
    %c0_51 = arith.constant 0 : index
    %77 = vector.load %arg5[%c0_48, %c0_49, %c0_50, %c0_51] : memref<1x16x16x128xf32, #tpu.memory_space<vmem>>, vector<1x16x16x128xf32>
    %78 = vector.shape_cast %77 : vector<1x16x16x128xf32> to vector<16x16x128xf32>
    %79 = vector.shape_cast %76 : vector<16x16x128xf32> to vector<1x16x16x128xf32>
    tpu.vector_store %arg5[%c0_48, %c0_49, %c0_50, %c0_51], %79 {strides = array<i32>} : memref<1x16x16x128xf32, #tpu.memory_space<vmem>>, vector<1x16x16x128xf32>,
    return
  }
  func.func @transform_0(%arg0: i32, %arg1: i32) -> (i32, i32, i32, i32) {
    %c0_i32 = arith.constant 0 : i32
    %c0_i32_0 = arith.constant 0 : i32
    %c0_i32_1 = arith.constant 0 : i32
    return %arg1, %c0_i32, %c0_i32_0, %arg0 : i32, i32, i32, i32
  }
  func.func @transform_1(%arg0: i32, %arg1: i32) -> (i32, i32, i32) {
    %c0_i32 = arith.constant 0 : i32
    %c0_i32_0 = arith.constant 0 : i32
    %c0_i32_1 = arith.constant 0 : i32
    return %c0_i32, %c0_i32_0, %arg0 : i32, i32, i32
  }
  func.func @transform_2(%arg0: i32, %arg1: i32) -> (i32, i32) {
    %c0_i32 = arith.constant 0 : i32
    %c0_i32_0 = arith.constant 0 : i32
    return %c0_i32, %arg0 : i32, i32
  }
  func.func @transform_3(%arg0: i32, %arg1: i32) -> (i32, i32, i32, i32) {
    %c0_i32 = arith.constant 0 : i32
    %c0_i32_0 = arith.constant 0 : i32
    %c0_i32_1 = arith.constant 0 : i32
    return %arg1, %c0_i32, %c0_i32_0, %arg0 : i32, i32, i32, i32
  }
}

</mosaic_0001>

<bundles_post_ra>
// kernel: tpu_custom_call.1
= control target key start
LH: loop header
LB: loop body
LE: loop exit
PB: predicated region body
PF: predicated region fallthrough
CT: control target
= control target key end

     0   :  { %8 = vsyncpa [#allocation4], 0  ;;  %s2446_s0 = inlined_call_operand.hbm [shape: f32[2,16,16,128], index: 0, kind: input, shape index: {}]   ;;  %s2447_s1 = inlined_call_operand.hbm [shape: f32[3,3,128], index: 1, kind: input, shape index: {}]   ;;  %s2448_s2 = inlined_call_operand.vmem [shape: f32[1,128], index: 2, kind: input, shape index: {}]   ;;  %s2449_s3 = inlined_call_operand.hbm [shape: f32[2,16,16,128], index: 3, kind: output, shape index: {}]  }
   0x1   :  { %10 = vsyncpa [#allocation4 + $0x1], 0 }
   0x2   :  { %11 = vsyncpa [#allocation7], 0 }
   0x3   :  { %12 = vsyncpa [#allocation5], 0 }
   0x4   :  { %14 = vsyncpa [#allocation5 + $0x1], 0  ;;  %s1692_s12 = smov 0   ;;  %s1694_s13 = smov 0  }
   0x5   :  { %s1696_s14 = smov 0   ;;  %s1698_s15 = smov 0  }
   0x6   :  { %s1700_s16 = smov 0   ;;  %s1702_s17 = smov 0  }
   0x7 LB: > { %s1413_s18 = sadd.s32 4294967295, %s1660_s17   ;;  %s1414_s19 = sadd.s32 4294967294, %s1660_s17   ;;  %s1660_s17 = sphi %s1702_s17, %s20_s17   ;;  %s1656_s16 = sphi %s1700_s16, %s2473_s16   ;;  %s1652_s15 = sphi %s1698_s15, %s2472_s15   ;;  %s1648_s14 = sphi %s1696_s14, %s2471_s14   ;;  %s1644_s13 = sphi %s1694_s13, %s2470_s13   ;;  %s1640_s12 = sphi %s1692_s12, %s2469_s12  }
   0x8   : > { %p54_p0 = scmp.ne.s32.totalorder %s1644_s13, %s1640_s12  ;;  %p1726_p1 = scmp.eq.s32.totalorder %s1413_s18, 0 }
   0x9   : > { %p1730_p2 = scmp.eq.s32.totalorder %s1413_s18, 1  ;;  %p138_p3 = scmp.eq.s32.totalorder %s1414_s19, 1 }
   0xa   : > { %s2454_s20 = scalar_select %p1726_p1, 1, 0 }
   0xb   : > { %s2455_s21 = scalar_select %p1730_p2, 1, 0 }
   0xc   : > { %p1736_p4 = por %p1726_p1, %p54_p0  ;;  %p1415_p5 = scmp.ge.s32.totalorder %s1660_s17, 1 }
   0xd   : > { %p1741_p6 = por %p138_p3, %p54_p0  ;;  %p145_p7 = scmp.lt.s32.totalorder %s1660_s17, 3 }
   0xe   : > { %s2456_s22 = scalar_select %p1736_p4, 1, 0 }
   0xf   : > { %s2457_s23 = scalar_select %p1741_p6, 1, 0 }
  0x10   : > { %p1746_p8 = pnand %p1415_p5, %p145_p7  ;;  %s1662_s25 = smov [#allocation6]  }
  0x11   : > { %s159_s26 = sshll.u32 %s1662_s25, 4  ;;  %s29_s28 = sadd.s32 1, %s1656_s16  ;;  %s160_s26 = int_to_ptr.vmem [resolvable:$true] %s159_s26 }
  0x12   : > { %s2458_s24 = scalar_select %p1746_p8, 1, 0 }
  0x13   : > { %p1442_p9 = pneg %p1746_p8  ;;  %s1516_s4 = scalar_lea.hbm %s2447_s1, 192 }
  0x14   : > { %p1517_p12 = scmp.ne.s32.totalorder %s2447_s1, %s1516_s4  ;;  %p1523_p5 = scmp.lt.u32.totalorder %s1516_s4, %s2447_s1 }
  0x15   : > { %p1755_p11 = pnand %p1442_p9, %p1726_p1 }
  0x17   : > { %p1518_p13 = pneg %p1755_p11 }
  0x19   : > { %p1519_p0 = pnand %p1518_p13, %p1517_p12 }
  0x1b   : > { %p1520_p3 = pneg %p1519_p0 }
  0x1d   : > { %p1525_p7 = pnand %p1523_p5, %p1520_p3 }
  0x1f   : > { %1528 = shalt.err (!%p1525_p7)
}
  0x20   : > { %s1529_s9 = scalar_lea.vmem %s160_s26, 192  ;;  %p1537_p1 = scmp.lt.s32.totalorder %s160_s26, %s160_s26 }
  0x21   : > { %p1530_p9 = scmp.ne.s32.totalorder %s160_s26, %s1529_s9  ;;  %p1538_p4 = scmp.lt.s32.totalorder %s1529_s9, %s1529_s9 }
  0x23   : > { %p1532_p10 = pnand %p1530_p9, %p1518_p13  ;;  %p1539_p8 = por %p1538_p4, %p1537_p1 }
  0x25   : > { %p1533_p6 = pneg %p1532_p10 }
  0x27   : > { %p1540_p2 = pnand %p1539_p8, %p1533_p6 }
  0x29   : > { %1543 = shalt.err (!%p1540_p2)
}
  0x2a   : > { %s1663_s10 = smov 64   ;;  %s1664_s11 = smov 4  }
  0x2b   : > { %1445 = dma.hbm_to_vmem [thread:$0]  (!%p1755_p11), %s2447_s1, 192, %s160_s26, [#allocation7], %s1663_s10, %s1663_s10, %s1664_s11  }
  0x2c   : > { %p30_p1 = scmp.ge.s32.totalorder %s29_s28, 2  ;;  %s41_s25 = sadd.s32 1, %s1648_s14 }
  0x2d   : > { %p48_p2 = scmp.ne.s32.totalorder %s1648_s14, %s1644_s13  ;;  %p49_p4 = scmp.eq.s32.totalorder %s1660_s17, 0 }
  0x2e   : > { %s2475_s28 = smov (%p30_p1, %s29_s28), 0  ;;  %p2461_p8 = scmp.ne.s32.totalorder %s2455_s21, 0 }
  0x2f   : > { %p1782_p6 = por %p49_p4, %p48_p2  ;;  %s36_s27 = ssub.s32 %s1656_s16, %s2475_s28 }
  0x30   : > { %p1788_p10 = por %p2461_p8, %p48_p2  ;;  %p1455_p12 = scmp.lt.s32.totalorder %s1660_s17, 2 }
  0x31   : > { %p39_p11 = scmp.eq.s32.totalorder %s36_s27, 0  ;;  %s179_s26 = sand.u32 1, %s1648_s14  }
  0x32   : > { %s1419_s4 = sshll.u32 %s179_s26, 8  ;;  %s1432_s6 = sshll.u32 %s1656_s16, 12 }
  0x33   : > { %s1797_s5 = scalar_select %p39_p11, %s1648_s14, %s41_s25  }
  0x34   : > { %s1803_s9 = scalar_lea.hbm %s2446_s0, %s1432_s6  ;;  %s183_s21 = scalar_lea.vmem [#allocation3], %s1419_s4 }
  0x35   : > { %s191_s10 = sshll.u32 %s183_s21, 4  ;;  %p1809_p13 = pnand %p1455_p12, %p1782_p6  ;;  %s1805_s10 = int_to_ptr.vmem [resolvable:$true] %s191_s10 }
  0x36   : > { %s1813_s18 = scalar_lea.sflag [#allocation4], %s179_s26  ;;  %s1544_s19 = scalar_lea.hbm %s1803_s9, 4096 }
  0x37   : > { %p1545_p0 = scmp.ne.s32.totalorder %s1803_s9, %s1544_s19  ;;  %p1546_p3 = pneg %p1809_p13 }
  0x38   : > { %s1549_s29 = scalar_lea.hbm %s2446_s0, 8192  ;;  %p1550_p9 = scmp.lt.u32.totalorder %s1803_s9, %s2446_s0 }
  0x39   : > { %p1547_p5 = pnand %p1546_p3, %p1545_p0  ;;  %p1551_p1 = scmp.lt.u32.totalorder %s1549_s29, %s1544_s19 }
  0x3a   : > { %p1553_p4 = scmp.lt.u32.totalorder %s1544_s19, %s1803_s9 }
  0x3b   : > { %p1548_p7 = pneg %p1547_p5  ;;  %p1552_p2 = por %p1551_p1, %p1550_p9 }
  0x3d   : > { %p1554_p6 = por %p1553_p4, %p1552_p2 }
  0x3f   : > { %p1555_p8 = pnand %p1554_p6, %p1548_p7 }
  0x41   : > { %1558 = shalt.err (!%p1555_p8)
}
  0x42   : > { %s1559_s26 = scalar_lea.vmem %s1805_s10, 4096  ;;  %s1665_s7 = smov [#allocation3]  }
  0x43   : > { %p1560_p12 = scmp.ne.s32.totalorder %s1805_s10, %s1559_s26  ;;  %s1564_s8 = sshll.u32 %s1665_s7, 4  ;;  %s1565_s8 = int_to_ptr.vmem [resolvable:$false] %s1564_s8 }
  0x44   : > { %s1566_s21 = scalar_lea.vmem %s1565_s8, 8192  ;;  %p1567_p5 = scmp.lt.s32.totalorder %s1805_s10, %s1565_s8 }
  0x45   : > { %p1562_p11 = pnand %p1560_p12, %p1546_p3  ;;  %p1568_p9 = scmp.lt.s32.totalorder %s1566_s21, %s1559_s26 }
  0x47   : > { %p1563_p0 = pneg %p1562_p11  ;;  %p1569_p1 = por %p1568_p9, %p1567_p5 }
  0x49   : > { %p1570_p2 = pnand %p1569_p1, %p1563_p0 }
  0x4b   : > { %1573 = shalt.err (!%p1570_p2)
}
  0x4c   : > { %s1666_s19 = smov 128   ;;  %s1667_s25 = smov 8  }
  0x4d   : > { %1449 = dma.hbm_to_vmem [thread:$0]  (!%p1809_p13), %s1803_s9, 4096, %s1805_s10, %s1813_s18, %s1666_s19, %s1666_s19, %s1667_s25  }
  0x4e   : > { %p2464_p3 = scmp.ne.s32.totalorder %s2458_s24, 0 }
  0x4f   : > { %s1844_s27 = sand.u32 (!%p2464_p3), 1, %s1644_s13   ;;  %p2465_p7 = scmp.ne.s32.totalorder (!%p2464_p3), %s2456_s22, 0 }
  0x50   : > { %203 = sbr.rel (%p2464_p3) target bundleno = 286 (0x11e), region = 32  ;;  %s1423_s29 = sshll.u32 (!%p2464_p3), %s1844_s27, 8 }
  0x51   : > { %s206_s4 = scalar_lea.sflag (!%p2464_p3), [#allocation4], %s1844_s27  ;;  %s1850_s6 = scalar_lea.vmem (!%p2464_p3), [#allocation3], %s1423_s29 }
  0x57   : > { %1627 = dma.done.wait (%p2465_p7), %s206_s4, 4096  }
  0x58   : > { %1629 = vsyncadd (%p2465_p7), %s206_s4, 4294963200  ;;  %p2466_p13 = scmp.ne.s32.totalorder %s2454_s20, 0 }
  0x5a   : > { %1631 = dma.done.wait (%p2466_p13), [#allocation7], 192  }
  0x5b   : > { %1633 = vsyncadd (%p2466_p13), [#allocation7], 4294967104  ;;  %v1668_v0 = vmov 0.0   ;;  %v382_v1 = vlaneseq  ;;  %v1861_v2 = vld [vmem:[%s1850_s6] sm:$0xff]  ;;  %v1864_v3 = vld [vmem:[%s1850_s6 + $0x8] sm:$0xff]  ;;  %s2033_s24 = scalar_lea.vmem [#allocation8], %s1423_s29 }
  0x5c   : > { %242 = vst [vmem:[#allocation2] sm:$0xff] %v1668_v0  ;;  %243 = vst [vmem:[#allocation2 + $0x8] sm:$0xff] %v1668_v0  ;;  %v1867_v4 = vld [vmem:[%s1850_s6 + $0x10] sm:$0xff]  ;;  %v1873_v5 = vld [vmem:[%s1850_s6 + $0x18] sm:$0xff]  ;;  %s1433_s11 = sshll.u32 %s1652_s15, 12  ;;  %s1304_s18 = sshll.u32 %s2033_s24, 4  ;;  %s2396_s18 = int_to_ptr.vmem [resolvable:$true] %s1304_s18 }
  0x5d   : > { %244 = vst [vmem:[#allocation2 + $0x10] sm:$0x3] %v1668_v0  ;;  %246 = vst [vmem:[#allocation2 + $0x198] sm:$0xff] %v1668_v0  ;;  %v1876_v6 = vld [vmem:[%s1850_s6 + $0x20] sm:$0xff]  ;;  %v1879_v7 = vld [vmem:[%s1850_s6 + $0x28] sm:$0xff]  ;;  %v383_v14 = vshrl.u32 %v382_v1, 7  ;;  %s2394_s8 = scalar_lea.hbm %s2449_s3, %s1433_s11 }
  0x5e   : > { %247 = vst [vmem:[#allocation2 + $0x1a0] sm:$0xff] %v1668_v0  ;;  %248 = vst [vmem:[#allocation2 + $0x1a8] sm:$0x3] %v1668_v0  ;;  %v1885_v8 = vld [vmem:[%s1850_s6 + $0x30] sm:$0xff]  ;;  %v1888_v9 = vld [vmem:[%s1850_s6 + $0x38] sm:$0xff]  ;;  %s1290_s21 = scalar_lea.sflag [#allocation5], %s1844_s27 }
  0x5f   : > { %250 = vst [vmem:[#allocation2 + $0x18] sm:$0x1] %v1668_v0  ;;  %251 = vst [vmem:[#allocation2 + $0x30] sm:$0x1] %v1668_v0  ;;  %v1891_v10 = vld [vmem:[%s1850_s6 + $0x40] sm:$0xff]  ;;  %v1897_v11 = vld [vmem:[%s1850_s6 + $0x48] sm:$0xff] }
  0x60   : > { %252 = vst [vmem:[#allocation2 + $0x48] sm:$0x1] %v1668_v0  ;;  %253 = vst [vmem:[#allocation2 + $0x60] sm:$0x1] %v1668_v0  ;;  %v1900_v12 = vld [vmem:[%s1850_s6 + $0x50] sm:$0xff]  ;;  %v1903_v13 = vld [vmem:[%s1850_s6 + $0x58] sm:$0xff] }
  0x61   : > { %254 = vst [vmem:[#allocation2 + $0x78] sm:$0x1] %v1668_v0  ;;  %255 = vst [vmem:[#allocation2 + $0x90] sm:$0x1] %v1668_v0  ;;  %v1909_v15 = vld [vmem:[%s1850_s6 + $0x60] sm:$0xff]  ;;  %v1912_v16 = vld [vmem:[%s1850_s6 + $0x68] sm:$0xff] }
  0x62   : > { %256 = vst [vmem:[#allocation2 + $0xa8] sm:$0x1] %v1668_v0  ;;  %257 = vst [vmem:[#allocation2 + $0xc0] sm:$0x1] %v1668_v0  ;;  %v1915_v17 = vld [vmem:[%s1850_s6 + $0x70] sm:$0xff]  ;;  %v1921_v18 = vld [vmem:[%s1850_s6 + $0x78] sm:$0xff] }
  0x63   : > { %258 = vst [vmem:[#allocation2 + $0xd8] sm:$0x1] %v1668_v0  ;;  %259 = vst [vmem:[#allocation2 + $0xf0] sm:$0x1] %v1668_v0  ;;  %v1924_v19 = vld [vmem:[%s1850_s6 + $0x80] sm:$0xff]  ;;  %v1927_v20 = vld [vmem:[%s1850_s6 + $0x88] sm:$0xff] }
  0x64   : > { %260 = vst [vmem:[#allocation2 + $0x108] sm:$0x1] %v1668_v0  ;;  %261 = vst [vmem:[#allocation2 + $0x120] sm:$0x1] %v1668_v0  ;;  %v300_v21 = vld [vmem:[%s1850_s6 + $0x90] sm:$0xff]  ;;  %v301_v22 = vld [vmem:[%s1850_s6 + $0x98] sm:$0xff] }
  0x65   : > { %262 = vst [vmem:[#allocation2 + $0x138] sm:$0x1] %v1668_v0  ;;  %263 = vst [vmem:[#allocation2 + $0x150] sm:$0x1] %v1668_v0  ;;  %v302_v23 = vld [vmem:[%s1850_s6 + $0xa0] sm:$0xff]  ;;  %v303_v24 = vld [vmem:[%s1850_s6 + $0xa8] sm:$0xff] }
  0x66   : > { %264 = vst [vmem:[#allocation2 + $0x168] sm:$0x1] %v1668_v0  ;;  %265 = vst [vmem:[#allocation2 + $0x180] sm:$0x1] %v1668_v0  ;;  %v304_v25 = vld [vmem:[%s1850_s6 + $0xb0] sm:$0xff]  ;;  %v305_v26 = vld [vmem:[%s1850_s6 + $0xb8] sm:$0xff] }
  0x67   : > { %266 = vst [vmem:[#allocation2 + $0x29] sm:$0x1] %v1668_v0  ;;  %267 = vst [vmem:[#allocation2 + $0x41] sm:$0x1] %v1668_v0  ;;  %v384_v27 = vsub.s32 0, %v383_v14  ;;  %v490_v28 = vsub.s32 1, %v383_v14 }
  0x68   : > { %268 = vst [vmem:[#allocation2 + $0x59] sm:$0x1] %v1668_v0  ;;  %269 = vst [vmem:[#allocation2 + $0x71] sm:$0x1] %v1668_v0  ;;  %v590_v29 = vsub.s32 2, %v383_v14  ;;  %v306_v30 = vld [vmem:[%s1850_s6 + $0xc0] sm:$0xff] }
  0x69   : > { %270 = vst [vmem:[#allocation2 + $0x89] sm:$0x1] %v1668_v0  ;;  %271 = vst [vmem:[#allocation2 + $0xa1] sm:$0x1] %v1668_v0  ;;  %v307_v31 = vld [vmem:[%s1850_s6 + $0xc8] sm:$0xff]  ;;  %v308_v32 = vld [vmem:[%s1850_s6 + $0xd0] sm:$0xff] }
  0x6a   : > { %272 = vst [vmem:[#allocation2 + $0xb9] sm:$0x1] %v1668_v0  ;;  %273 = vst [vmem:[#allocation2 + $0xd1] sm:$0x1] %v1668_v0  ;;  %v309_v33 = vld [vmem:[%s1850_s6 + $0xd8] sm:$0xff]  ;;  %v310_v34 = vld [vmem:[%s1850_s6 + $0xe0] sm:$0xff] }
  0x6b   : > { %274 = vst [vmem:[#allocation2 + $0xe9] sm:$0x1] %v1668_v0  ;;  %275 = vst [vmem:[#allocation2 + $0x101] sm:$0x1] %v1668_v0  ;;  %v311_v35 = vld [vmem:[%s1850_s6 + $0xe8] sm:$0xff]  ;;  %v312_v36 = vld [vmem:[%s1850_s6 + $0xf0] sm:$0xff] }
  0x6c   : > { %276 = vst [vmem:[#allocation2 + $0x119] sm:$0x1] %v1668_v0  ;;  %277 = vst [vmem:[#allocation2 + $0x131] sm:$0x1] %v1668_v0  ;;  %v313_v37 = vld [vmem:[%s1850_s6 + $0xf8] sm:$0xff]  ;;  %s1574_s19 = scalar_lea.vmem %s2396_s18, 4096 }
  0x6d   : > { %278 = vst [vmem:[#allocation2 + $0x149] sm:$0x1] %v1668_v0  ;;  %279 = vst [vmem:[#allocation2 + $0x161] sm:$0x1] %v1668_v0  ;;  %v346_v38 = vld [vmem:[#allocation6] sm:$0x7]  ;;  %p1575_p4 = scmp.ne.s32.totalorder %s2396_s18, %s1574_s19 }
  0x6e   : > { %280 = vst [vmem:[#allocation2 + $0x179] sm:$0x1] %v1668_v0  ;;  %281 = vst [vmem:[#allocation2 + $0x191] sm:$0x1] %v1668_v0  ;;  %v347_v39 = vld [vmem:[#allocation6 + $0x4] sm:$0x7]  ;;  %v1946_v41 = vrot.slane %v346_v38, %v384_v27  ;;  %v1948_v42 = vrot.slane %v346_v38, %v490_v28  ;;  %v1950_v43 = vrot.slane %v346_v38, %v590_v29 }
  0x6f   : > { %314 = vst [vmem:[#allocation2 + $0x19] sm:$0xff] %v1861_v2  ;;  %315 = vst [vmem:[#allocation2 + $0x21] sm:$0xff] %v1864_v3  ;;  %v348_v40 = vld [vmem:[#allocation6 + $0x8] sm:$0x7]  ;;  %v1955_v44 = vld [vmem:[%s2448_s2] ss:$0 sm:$0xff]  ;;  %v1959_v50 = vrot.slane %v347_v39, %v384_v27  ;;  %v1961_v51 = vrot.slane %v347_v39, %v590_v29  ;;  %v1968_v60 = vrot.slane %v347_v39, %v490_v28  ;;  %p1576_p6 = pnand %p1575_p4, %p1788_p10 }
  0x70   : > { %316 = vst [vmem:[#allocation2 + $0x31] sm:$0xff] %v1867_v4  ;;  %317 = vst [vmem:[#allocation2 + $0x39] sm:$0xff] %v1873_v5  ;;  %v456_v45 = vld [vmem:[#allocation2 + $0x1] sm:$0xff]  ;;  %v386_v47 = vmul.f32 0.0, %v1946_v41  ;;  %v457_v52 = vld [vmem:[#allocation2 + $0x9] sm:$0xff]  ;;  %v1965_v58 = vrot.slane %v348_v40, %v384_v27  ;;  %v1970_v62 = vrot.slane %v348_v40, %v490_v28  ;;  %v1972_v63 = vrot.slane %v348_v40, %v590_v29  ;;  %s1669_s15 = smov [#allocation8]  }
  0x71   : > { %318 = vst [vmem:[#allocation2 + $0x49] sm:$0xff] %v1876_v6  ;;  %319 = vst [vmem:[#allocation2 + $0x51] sm:$0xff] %v1879_v7  ;;  %v556_v46 = vld [vmem:[#allocation2 + $0x2] sm:$0xff]  ;;  %v492_v48 = vmul.f32 %v1948_v42, %v456_v45  ;;  %v557_v53 = vld [vmem:[#allocation2 + $0xa] sm:$0xff]  ;;  %v493_v59 = vmul.f32 %v1948_v42, %v457_v52  ;;  %v494_v29 = vmul.f32 %v1948_v42, %v1861_v2  ;;  %p1577_p8 = pneg %p1576_p6  ;;  %s1578_s25 = sshll.u32 %s1669_s15, 4  ;;  %s1579_s25 = int_to_ptr.vmem [resolvable:$false] %s1578_s25 }
  0x72   : > { %320 = vst [vmem:[#allocation2 + $0x61] sm:$0xff] %v1885_v8  ;;  %321 = vst [vmem:[#allocation2 + $0x69] sm:$0xff] %v1888_v9  ;;  %v424_v55 = vadd.f32 %v1955_v44, %v386_v47  ;;  %v592_v56 = vmul.f32 %v1950_v43, %v556_v46  ;;  %v593_v0 = vmul.f32 %v1950_v43, %v557_v53  ;;  %s1580_s29 = scalar_lea.vmem %s1579_s25, 8192  ;;  %p1581_p12 = scmp.lt.s32.totalorder %s2396_s18, %s1579_s25 }
  0x73   : > { %322 = vst [vmem:[#allocation2 + $0x79] sm:$0xff] %v1891_v10  ;;  %323 = vst [vmem:[#allocation2 + $0x81] sm:$0xff] %v1897_v11  ;;  %v1094_v45 = vmul.f32 %v1970_v62, %v1873_v5  ;;  %v495_v52 = vmul.f32 %v1948_v42, %v1864_v3  ;;  %p1582_p11 = scmp.lt.s32.totalorder %s1580_s29, %s1574_s19 }
  0x74   : > { %324 = vst [vmem:[#allocation2 + $0x91] sm:$0xff] %v1900_v12  ;;  %325 = vst [vmem:[#allocation2 + $0x99] sm:$0xff] %v1903_v13  ;;  %v524_v1 = vadd.f32 %v492_v48, %v424_v55 }
  0x75   : > { %326 = vst [vmem:[#allocation2 + $0xa9] sm:$0xff] %v1909_v15  ;;  %327 = vst [vmem:[#allocation2 + $0xb1] sm:$0xff] %v1912_v16  ;;  %p1583_p0 = por %p1582_p11, %p1581_p12 }
  0x76   : > { %328 = vst [vmem:[#allocation2 + $0xc1] sm:$0xff] %v1915_v17  ;;  %329 = vst [vmem:[#allocation2 + $0xc9] sm:$0xff] %v1921_v18  ;;  %v656_v49 = vld [vmem:[#allocation2 + $0x18] sm:$0xff]  ;;  %v657_v54 = vld [vmem:[#allocation2 + $0x20] sm:$0xff] }
  0x77   : > { %330 = vst [vmem:[#allocation2 + $0xd9] sm:$0xff] %v1924_v19  ;;  %331 = vst [vmem:[#allocation2 + $0xe1] sm:$0xff] %v1927_v20  ;;  %v856_v57 = vld [vmem:[#allocation2 + $0x1a] sm:$0xff]  ;;  %v957_v61 = vld [vmem:[#allocation2 + $0x30] sm:$0xff]  ;;  %v692_v14 = vmul.f32 %v1959_v50, %v656_v49  ;;  %v388_v28 = vmul.f32 %v656_v49, %v1946_v41  ;;  %v389_v49 = vmul.f32 %v657_v54, %v1946_v41  ;;  %p1584_p5 = pnand %p1583_p0, %p1577_p8 }
  0x78   : > { %332 = vst [vmem:[#allocation2 + $0xf1] sm:$0xff] %v300_v21  ;;  %333 = vst [vmem:[#allocation2 + $0xf9] sm:$0xff] %v301_v22  ;;  %v1157_v21 = vld [vmem:[#allocation2 + $0x32] sm:$0xff]  ;;  %v525_v22 = vadd.f32 %v493_v59, %v424_v55  ;;  %v594_v47 = vmul.f32 %v856_v57, %v1950_v43  ;;  %v1997_v48 = vld [vmem:[#allocation2 + $0x48] sm:$0xff]  ;;  %v694_v59 = vmul.f32 %v957_v61, %v1959_v50 }
  0x79   : > { %334 = vst [vmem:[#allocation2 + $0x109] sm:$0xff] %v302_v23  ;;  %335 = vst [vmem:[#allocation2 + $0x111] sm:$0xff] %v303_v24  ;;  %v693_v23 = vmul.f32 %v1959_v50, %v657_v54  ;;  %v857_v24 = vld [vmem:[#allocation2 + $0x22] sm:$0xff]  ;;  %v958_v27 = vld [vmem:[#allocation2 + $0x38] sm:$0xff]  ;;  %v426_v38 = vadd.f32 %v1955_v44, %v388_v28 }
  0x7a   : > { %336 = vst [vmem:[#allocation2 + $0x121] sm:$0xff] %v304_v25  ;;  %337 = vst [vmem:[#allocation2 + $0x129] sm:$0xff] %v305_v26  ;;  %v792_v25 = vmul.f32 %v1968_v60, %v1861_v2  ;;  %v892_v26 = vmul.f32 %v1961_v51, %v856_v57  ;;  %v994_v40 = vmul.f32 %v1965_v58, %v958_v27 }
  0x7b   : > { %338 = vst [vmem:[#allocation2 + $0x139] sm:$0xff] %v306_v30  ;;  %339 = vst [vmem:[#allocation2 + $0x141] sm:$0xff] %v307_v31  ;;  %v624_v30 = vadd.f32 %v592_v56, %v524_v1  ;;  %v993_v31 = vmul.f32 %v1965_v58, %v957_v61  ;;  %v526_v46 = vadd.f32 %v494_v29, %v426_v38 }
  0x7c   : > { %340 = vst [vmem:[#allocation2 + $0x151] sm:$0xff] %v308_v32  ;;  %341 = vst [vmem:[#allocation2 + $0x159] sm:$0xff] %v309_v33  ;;  %v625_v32 = vadd.f32 %v593_v0, %v525_v22  ;;  %v793_v33 = vmul.f32 %v1968_v60, %v1864_v3  ;;  %v794_v1 = vmul.f32 %v1968_v60, %v1867_v4 }
  0x7d   : > { %342 = vst [vmem:[#allocation2 + $0x169] sm:$0xff] %v310_v34  ;;  %343 = vst [vmem:[#allocation2 + $0x171] sm:$0xff] %v311_v35  ;;  %v1093_v34 = vmul.f32 %v1970_v62, %v1867_v4  ;;  %v1193_v35 = vmul.f32 %v1972_v63, %v1157_v21  ;;  %v724_v39 = vadd.f32 %v692_v14, %v624_v30 }
  0x7e   : > { %344 = vst [vmem:[#allocation2 + $0x181] sm:$0xff] %v312_v36  ;;  %345 = vst [vmem:[#allocation2 + $0x189] sm:$0xff] %v313_v37  ;;  %v893_v36 = vmul.f32 %v1961_v51, %v857_v24  ;;  %v1990_v37 = vld [vmem:[#allocation2 + $0x3a] sm:$0xff]  ;;  %v725_v2 = vadd.f32 %v693_v23, %v625_v32  ;;  %v626_v0 = vadd.f32 %v594_v47, %v526_v46 }
  0x7f   : > { %v824_v53 = vadd.f32 %v792_v25, %v724_v39  ;;  %v1194_v56 = vmul.f32 %v1972_v63, %v1990_v37  ;;  %v894_v57 = vmul.f32 %v1157_v21, %v1961_v51  ;;  %v427_v14 = vadd.f32 %v1955_v44, %v389_v49 }
  0x80   : > { %v825_v55 = vadd.f32 %v793_v33, %v725_v2  ;;  %v995_v3 = vmul.f32 %v1965_v58, %v1997_v48  ;;  %v595_v23 = vmul.f32 %v857_v24, %v1950_v43  ;;  %v726_v25 = vadd.f32 %v694_v59, %v626_v0 }
  0x81   : > { %v924_v22 = vadd.f32 %v892_v26, %v824_v53  ;;  %v527_v28 = vadd.f32 %v495_v52, %v427_v14  ;;  %v390_v29 = vmul.f32 %v957_v61, %v1946_v41  ;;  %v496_v30 = vmul.f32 %v1948_v42, %v1867_v4  ;;  %v960_v52 = vld [vmem:[#allocation2 + $0x50] sm:$0xff] }
  0x82   : > { %v925_v54 = vadd.f32 %v893_v36, %v825_v55  ;;  %v1095_v38 = vmul.f32 %v1970_v62, %v1876_v6  ;;  %v695_v26 = vmul.f32 %v958_v27, %v1959_v50  ;;  %v826_v36 = vadd.f32 %v794_v1, %v726_v25  ;;  %v1160_v1 = vld [vmem:[#allocation2 + $0x52] sm:$0xff] }
  0x83   : > { %v1025_v32 = vadd.f32 %v993_v31, %v924_v22  ;;  %v627_v39 = vadd.f32 %v595_v23, %v527_v28  ;;  %v795_v2 = vmul.f32 %v1968_v60, %v1873_v5  ;;  %v428_v24 = vadd.f32 %v1955_v44, %v390_v29 }
  0x84   : > { %v1026_v33 = vadd.f32 %v994_v40, %v925_v54  ;;  %v895_v61 = vmul.f32 %v1990_v37, %v1961_v51  ;;  %v596_v4 = vmul.f32 %v1157_v21, %v1950_v43  ;;  %v926_v31 = vadd.f32 %v894_v57, %v826_v36  ;;  %v1159_v40 = vld [vmem:[#allocation2 + $0x4a] sm:$0xff]  ;;  %v961_v57 = vld [vmem:[#allocation2 + $0x60] sm:$0xff] }
  0x85   : > { %v1125_v46 = vadd.f32 %v1093_v34, %v1025_v32  ;;  %v727_v49 = vadd.f32 %v695_v26, %v627_v39  ;;  %v528_v53 = vadd.f32 %v496_v30, %v428_v24  ;;  %v696_v55 = vmul.f32 %v1997_v48, %v1959_v50 }
  0x86   : > { %v1126_v47 = vadd.f32 %v1094_v45, %v1026_v33  ;;  %v796_v34 = vmul.f32 %v1968_v60, %v1876_v6  ;;  %v391_v45 = vmul.f32 %v958_v27, %v1946_v41  ;;  %v1027_v14 = vadd.f32 %v995_v3, %v926_v31 }
  0x87   : > { %v1225_v59 = vadd.f32 %v1193_v35, %v1125_v46  ;;  %v827_v22 = vadd.f32 %v795_v2, %v727_v49  ;;  %v628_v21 = vadd.f32 %v596_v4, %v528_v53  ;;  %v497_v54 = vmul.f32 %v1948_v42, %v1873_v5  ;;  %v1161_v2 = vld [vmem:[#allocation2 + $0x62] sm:$0xff] }
  0x88   : > { %v1226_v0 = vadd.f32 %v1194_v56, %v1126_v47  ;;  %v1195_v35 = vmul.f32 %v1972_v63, %v1159_v40  ;;  %v996_v56 = vmul.f32 %v1965_v58, %v960_v52  ;;  %v1096_v27 = vmul.f32 %v1970_v62, %v1879_v7 }
  0x89   : > { %1257 = vst [vmem:[%s2033_s24] sm:$0xff] %v1225_v59  ;;  %v429_v3 = vadd.f32 %v1955_v44, %v391_v45  ;;  %v1127_v23 = vadd.f32 %v1095_v38, %v1027_v14  ;;  %v927_v25 = vadd.f32 %v895_v61, %v827_v22  ;;  %v1196_v5 = vmul.f32 %v1972_v63, %v1160_v1  ;;  %v1162_v22 = vld [vmem:[#allocation2 + $0x6a] sm:$0xff] }
  0x8a   : > { %1258 = vst [vmem:[%s2033_s24 + $0x8] sm:$0xff] %v1226_v0  ;;  %v728_v28 = vadd.f32 %v696_v55, %v628_v21  ;;  %v896_v29 = vmul.f32 %v1159_v40, %v1961_v51  ;;  %v997_v30 = vmul.f32 %v1965_v58, %v961_v57  ;;  %v597_v33 = vmul.f32 %v1990_v37, %v1950_v43  ;;  %v962_v0 = vld [vmem:[#allocation2 + $0x68] sm:$0xff] }
  0x8b   : > { %v529_v32 = vadd.f32 %v497_v54, %v429_v3  ;;  %v1227_v26 = vadd.f32 %v1195_v35, %v1127_v23  ;;  %v1028_v36 = vadd.f32 %v996_v56, %v927_v25  ;;  %v392_v38 = vmul.f32 %v1997_v48, %v1946_v41 }
  0x8c   : > { %v828_v39 = vadd.f32 %v796_v34, %v728_v28  ;;  %v697_v46 = vmul.f32 %v960_v52, %v1959_v50  ;;  %v797_v47 = vmul.f32 %v1968_v60, %v1879_v7  ;;  %v498_v61 = vmul.f32 %v1948_v42, %v1876_v6 }
  0x8d   : > { %v629_v24 = vadd.f32 %v597_v33, %v529_v32  ;;  %1259 = vst [vmem:[%s2033_s24 + $0x10] sm:$0xff] %v1227_v26  ;;  %v1128_v4 = vadd.f32 %v1096_v27, %v1028_v36  ;;  %v1097_v31 = vmul.f32 %v1970_v62, %v1885_v8  ;;  %v430_v49 = vadd.f32 %v1955_v44, %v392_v38  ;;  %v1163_v33 = vld [vmem:[#allocation2 + $0x7a] sm:$0xff] }
  0x8e   : > { %v928_v37 = vadd.f32 %v896_v29, %v828_v39  ;;  %v1197_v48 = vmul.f32 %v1972_v63, %v1161_v2  ;;  %v598_v45 = vmul.f32 %v1159_v40, %v1950_v43  ;;  %v897_v6 = vmul.f32 %v1160_v1, %v1961_v51 }
  0x8f   : > { %v729_v53 = vadd.f32 %v697_v46, %v629_v24  ;;  %v1228_v55 = vadd.f32 %v1196_v5, %v1128_v4  ;;  %v530_v34 = vadd.f32 %v498_v61, %v430_v49  ;;  %v393_v21 = vmul.f32 %v960_v52, %v1946_v41  ;;  %v963_v5 = vld [vmem:[#allocation2 + $0x78] sm:$0xff] }
  0x90   : > { %v1029_v59 = vadd.f32 %v997_v30, %v928_v37  ;;  %v499_v54 = vmul.f32 %v1948_v42, %v1879_v7  ;;  %v698_v27 = vmul.f32 %v961_v57, %v1959_v50  ;;  %v798_v3 = vmul.f32 %v1968_v60, %v1885_v8 }
  0x91   : > { %v829_v14 = vadd.f32 %v797_v47, %v729_v53  ;;  %1260 = vst [vmem:[%s2033_s24 + $0x18] sm:$0xff] %v1228_v55  ;;  %v630_v56 = vadd.f32 %v598_v45, %v530_v34  ;;  %v998_v40 = vmul.f32 %v1965_v58, %v962_v0  ;;  %v1098_v25 = vmul.f32 %v1970_v62, %v1888_v9  ;;  %v964_v55 = vld [vmem:[#allocation2 + $0x80] sm:$0xff] }
  0x92   : > { %v1129_v35 = vadd.f32 %v1097_v31, %v1029_v59  ;;  %v431_v52 = vadd.f32 %v1955_v44, %v393_v21  ;;  %v1198_v7 = vmul.f32 %v1972_v63, %v1162_v22  ;;  %v599_v30 = vmul.f32 %v1160_v1, %v1950_v43 }
  0x93   : > { %v929_v23 = vadd.f32 %v897_v6, %v829_v14  ;;  %v730_v29 = vadd.f32 %v698_v27, %v630_v56  ;;  %v394_v36 = vmul.f32 %v961_v57, %v1946_v41  ;;  %v500_v39 = vmul.f32 %v1948_v42, %v1885_v8 }
  0x94   : > { %v1229_v28 = vadd.f32 %v1197_v48, %v1129_v35  ;;  %v531_v26 = vadd.f32 %v499_v54, %v431_v52  ;;  %v898_v24 = vmul.f32 %v1161_v2, %v1961_v51  ;;  %v999_v46 = vmul.f32 %v1965_v58, %v963_v5  ;;  %v965_v52 = vld [vmem:[#allocation2 + $0x90] sm:$0xff] }
  0x95   : > { %v1030_v32 = vadd.f32 %v998_v40, %v929_v23  ;;  %v830_v38 = vadd.f32 %v798_v3, %v730_v29  ;;  %v699_v47 = vmul.f32 %v962_v0, %v1959_v50  ;;  %v799_v1 = vmul.f32 %v1968_v60, %v1888_v9 }
  0x96   : > { %1261 = vst [vmem:[%s2033_s24 + $0x20] sm:$0xff] %v1229_v28  ;;  %v631_v4 = vadd.f32 %v599_v30, %v531_v26  ;;  %v432_v37 = vadd.f32 %v1955_v44, %v394_v36  ;;  %v1099_v8 = vmul.f32 %v1970_v62, %v1891_v10  ;;  %v1199_v31 = vmul.f32 %v1972_v63, %v1163_v33  ;;  %v1165_v30 = vld [vmem:[#allocation2 + $0x92] sm:$0xff] }
  0x97   : > { %v1130_v61 = vadd.f32 %v1098_v25, %v1030_v32  ;;  %v930_v57 = vadd.f32 %v898_v24, %v830_v38  ;;  %v600_v49 = vmul.f32 %v1161_v2, %v1950_v43  ;;  %v395_v34 = vmul.f32 %v962_v0, %v1946_v41  ;;  %v1164_v25 = vld [vmem:[#allocation2 + $0x82] sm:$0xff] }
  0x98   : > { %v731_v53 = vadd.f32 %v699_v47, %v631_v4  ;;  %v532_v59 = vadd.f32 %v500_v39, %v432_v37  ;;  %v899_v14 = vmul.f32 %v1162_v22, %v1961_v51  ;;  %v700_v6 = vmul.f32 %v963_v5, %v1959_v50 }
  0x99   : > { %v1230_v48 = vadd.f32 %v1198_v7, %v1130_v61  ;;  %v1031_v45 = vadd.f32 %v999_v46, %v930_v57  ;;  %v501_v21 = vmul.f32 %v1948_v42, %v1888_v9  ;;  %v800_v2 = vmul.f32 %v1968_v60, %v1891_v10  ;;  %v966_v57 = vld [vmem:[#allocation2 + $0x98] sm:$0xff] }
  0x9a   : > { %v831_v54 = vadd.f32 %v799_v1, %v731_v53  ;;  %v632_v35 = vadd.f32 %v600_v49, %v532_v59  ;;  %v433_v56 = vadd.f32 %v1955_v44, %v395_v34  ;;  %v1000_v3 = vmul.f32 %v1965_v58, %v964_v55 }
  0x9b   : > { %1262 = vst [vmem:[%s2033_s24 + $0x28] sm:$0xff] %v1230_v48  ;;  %v1131_v27 = vadd.f32 %v1099_v8, %v1031_v45  ;;  %v1100_v0 = vmul.f32 %v1970_v62, %v1897_v11  ;;  %v900_v23 = vmul.f32 %v1163_v33, %v1961_v51  ;;  %v601_v7 = vmul.f32 %v1162_v22, %v1950_v43 }
  0x9c   : > { %v931_v40 = vadd.f32 %v899_v14, %v831_v54  ;;  %v732_v9 = vadd.f32 %v700_v6, %v632_v35  ;;  %v533_v28 = vadd.f32 %v501_v21, %v433_v56  ;;  %v701_v32 = vmul.f32 %v964_v55, %v1959_v50 }
  0x9d   : > { %v1231_v29 = vadd.f32 %v1199_v31, %v1131_v27  ;;  %v396_v26 = vmul.f32 %v963_v5, %v1946_v41  ;;  %v502_v36 = vmul.f32 %v1948_v42, %v1891_v10  ;;  %v801_v46 = vmul.f32 %v1968_v60, %v1897_v11 }
  0x9e   : > { %v1032_v39 = vadd.f32 %v1000_v3, %v931_v40  ;;  %v832_v38 = vadd.f32 %v800_v2, %v732_v9  ;;  %v633_v24 = vadd.f32 %v601_v7, %v533_v28  ;;  %v1200_v47 = vmul.f32 %v1972_v63, %v1164_v25  ;;  %v1166_v2 = vld [vmem:[#allocation2 + $0x9a] sm:$0xff]  ;;  %v967_v3 = vld [vmem:[#allocation2 + $0xa8] sm:$0xff] }
  0x9f   : > { %1263 = vst [vmem:[%s2033_s24 + $0x30] sm:$0xff] %v1231_v29  ;;  %v1001_v22 = vmul.f32 %v1965_v58, %v965_v52  ;;  %v1101_v61 = vmul.f32 %v1970_v62, %v1900_v12  ;;  %v434_v4 = vadd.f32 %v1955_v44, %v396_v26  ;;  %v1201_v10 = vmul.f32 %v1972_v63, %v1165_v30  ;;  %v1167_v28 = vld [vmem:[#allocation2 + $0xaa] sm:$0xff] }
  0xa0   : > { %v1132_v5 = vadd.f32 %v1100_v0, %v1032_v39  ;;  %v932_v1 = vadd.f32 %v900_v23, %v832_v38  ;;  %v733_v37 = vadd.f32 %v701_v32, %v633_v24  ;;  %v602_v31 = vmul.f32 %v1163_v33, %v1950_v43 }
  0xa1   : > { %v534_v8 = vadd.f32 %v502_v36, %v434_v4  ;;  %v397_v49 = vmul.f32 %v964_v55, %v1946_v41  ;;  %v503_v48 = vmul.f32 %v1948_v42, %v1897_v11  ;;  %v901_v45 = vmul.f32 %v1164_v25, %v1961_v51  ;;  %v968_v4 = vld [vmem:[#allocation2 + $0xb0] sm:$0xff] }
  0xa2   : > { %v1232_v53 = vadd.f32 %v1200_v47, %v1132_v5  ;;  %v1033_v59 = vadd.f32 %v1001_v22, %v932_v1  ;;  %v833_v34 = vadd.f32 %v801_v46, %v733_v37  ;;  %v702_v6 = vmul.f32 %v965_v52, %v1959_v50 }
  0xa3   : > { %v634_v14 = vadd.f32 %v602_v31, %v534_v8  ;;  %v802_v21 = vmul.f32 %v1968_v60, %v1900_v12  ;;  %v435_v54 = vadd.f32 %v1955_v44, %v397_v49  ;;  %v1002_v55 = vmul.f32 %v1965_v58, %v966_v57 }
  0xa4   : > { %1264 = vst [vmem:[%s2033_s24 + $0x38] sm:$0xff] %v1232_v53  ;;  %v1133_v33 = vadd.f32 %v1101_v61, %v1033_v59  ;;  %v933_v35 = vadd.f32 %v901_v45, %v833_v34  ;;  %v1102_v11 = vmul.f32 %v1970_v62, %v1903_v13  ;;  %v902_v27 = vmul.f32 %v1165_v30, %v1961_v51 }
  0xa5   : > { %v734_v56 = vadd.f32 %v702_v6, %v634_v14  ;;  %v535_v0 = vadd.f32 %v503_v48, %v435_v54  ;;  %v603_v23 = vmul.f32 %v1164_v25, %v1950_v43  ;;  %v398_v7 = vmul.f32 %v965_v52, %v1946_v41  ;;  %v1168_v6 = vld [vmem:[#allocation2 + $0xb2] sm:$0xff]  ;;  %v969_v54 = vld [vmem:[#allocation2 + $0xc0] sm:$0xff] }
  0xa6   : > { %v1233_v40 = vadd.f32 %v1201_v10, %v1133_v33  ;;  %v1034_v9 = vadd.f32 %v1002_v55, %v933_v35  ;;  %v504_v29 = vmul.f32 %v1948_v42, %v1900_v12  ;;  %v703_v36 = vmul.f32 %v966_v57, %v1959_v50 }
  0xa7   : > { %v834_v32 = vadd.f32 %v802_v21, %v734_v56  ;;  %v635_v26 = vadd.f32 %v603_v23, %v535_v0  ;;  %v803_v39 = vmul.f32 %v1968_v60, %v1903_v13  ;;  %v1202_v24 = vmul.f32 %v1972_v63, %v1166_v2  ;;  %v1169_v56 = vld [vmem:[#allocation2 + $0xc2] sm:$0xff] }
  0xa8   : > { %1265 = vst [vmem:[%s2033_s24 + $0x40] sm:$0xff] %v1233_v40  ;;  %v1134_v38 = vadd.f32 %v1102_v11, %v1034_v9  ;;  %v1003_v25 = vmul.f32 %v1965_v58, %v967_v3  ;;  %v436_v46 = vadd.f32 %v1955_v44, %v398_v7  ;;  %v1103_v12 = vmul.f32 %v1970_v62, %v1909_v15 }
  0xa9   : > { %v934_v52 = vadd.f32 %v902_v27, %v834_v32  ;;  %v1203_v47 = vmul.f32 %v1972_v63, %v1167_v28  ;;  %v735_v22 = vadd.f32 %v703_v36, %v635_v26  ;;  %v604_v1 = vmul.f32 %v1165_v30, %v1950_v43 }
  0xaa   : > { %v1234_v61 = vadd.f32 %v1202_v24, %v1134_v38  ;;  %v536_v5 = vadd.f32 %v504_v29, %v436_v46  ;;  %v399_v10 = vmul.f32 %v966_v57, %v1946_v41  ;;  %v903_v31 = vmul.f32 %v1166_v2, %v1961_v51  ;;  %v970_v24 = vld [vmem:[#allocation2 + $0xc8] sm:$0xff] }
  0xab   : > { %v1035_v37 = vadd.f32 %v1003_v25, %v934_v52  ;;  %v835_v8 = vadd.f32 %v803_v39, %v735_v22  ;;  %v505_v49 = vmul.f32 %v1948_v42, %v1903_v13  ;;  %v704_v53 = vmul.f32 %v967_v3, %v1959_v50 }
  0xac   : > { %1266 = vst [vmem:[%s2033_s24 + $0x48] sm:$0xff] %v1234_v61  ;;  %v636_v48 = vadd.f32 %v604_v1, %v536_v5  ;;  %v804_v59 = vmul.f32 %v1968_v60, %v1909_v15  ;;  %v437_v34 = vadd.f32 %v1955_v44, %v399_v10  ;;  %v1004_v57 = vmul.f32 %v1965_v58, %v968_v4 }
  0xad   : > { %v1135_v45 = vadd.f32 %v1103_v12, %v1035_v37  ;;  %v935_v30 = vadd.f32 %v903_v31, %v835_v8  ;;  %v1104_v14 = vmul.f32 %v1970_v62, %v1912_v16  ;;  %v904_v13 = vmul.f32 %v1167_v28, %v1961_v51 }
  0xae   : > { %v736_v21 = vadd.f32 %v704_v53, %v636_v48  ;;  %v537_v33 = vadd.f32 %v505_v49, %v437_v34  ;;  %v605_v35 = vmul.f32 %v1166_v2, %v1950_v43  ;;  %v400_v27 = vmul.f32 %v967_v3, %v1946_v41  ;;  %v1170_v49 = vld [vmem:[#allocation2 + $0xca] sm:$0xff]  ;;  %v971_v53 = vld [vmem:[#allocation2 + $0xd8] sm:$0xff] }
  0xaf   : > { %v1235_v55 = vadd.f32 %v1203_v47, %v1135_v45  ;;  %v1036_v11 = vadd.f32 %v1004_v57, %v935_v30  ;;  %v506_v0 = vmul.f32 %v1948_v42, %v1909_v15  ;;  %v705_v9 = vmul.f32 %v968_v4, %v1959_v50  ;;  %v2186_v57 = vld [vmem:[#allocation2 + $0xda] sm:$0xff] }
  0xb0   : > { %v836_v23 = vadd.f32 %v804_v59, %v736_v21  ;;  %v637_v40 = vadd.f32 %v605_v35, %v537_v33  ;;  %v805_v7 = vmul.f32 %v1968_v60, %v1912_v16  ;;  %v1204_v32 = vmul.f32 %v1972_v63, %v1168_v6 }
  0xb1   : > { %1267 = vst [vmem:[%s2033_s24 + $0x50] sm:$0xff] %v1235_v55  ;;  %v1136_v29 = vadd.f32 %v1104_v14, %v1036_v11  ;;  %v1005_v2 = vmul.f32 %v1965_v58, %v969_v54  ;;  %v438_v26 = vadd.f32 %v1955_v44, %v400_v27  ;;  %v1105_v15 = vmul.f32 %v1970_v62, %v1915_v17 }
  0xb2   : > { %v936_v3 = vadd.f32 %v904_v13, %v836_v23  ;;  %v1205_v36 = vmul.f32 %v1972_v63, %v1169_v56  ;;  %v737_v39 = vadd.f32 %v705_v9, %v637_v40  ;;  %v606_v46 = vmul.f32 %v1167_v28, %v1950_v43  ;;  %v473_v9 = vld [vmem:[#allocation2 + $0xc9] sm:$0xff] }
  0xb3   : > { %v1236_v38 = vadd.f32 %v1204_v32, %v1136_v29  ;;  %v538_v25 = vadd.f32 %v506_v0, %v438_v26  ;;  %v401_v52 = vmul.f32 %v968_v4, %v1946_v41  ;;  %v905_v22 = vmul.f32 %v1168_v6, %v1961_v51 }
  0xb4   : > { %v1037_v12 = vadd.f32 %v1005_v2, %v936_v3  ;;  %v837_v47 = vadd.f32 %v805_v7, %v737_v39  ;;  %v507_v61 = vmul.f32 %v1948_v42, %v1912_v16  ;;  %v706_v1 = vmul.f32 %v969_v54, %v1959_v50  ;;  %v1172_v39 = vld [vmem:[#allocation2 + $0xe2] sm:$0xff] }
  0xb5   : > { %1268 = vst [vmem:[%s2033_s24 + $0x58] sm:$0xff] %v1236_v38  ;;  %v638_v5 = vadd.f32 %v606_v46, %v538_v25  ;;  %v806_v10 = vmul.f32 %v1968_v60, %v1915_v17  ;;  %v439_v37 = vadd.f32 %v1955_v44, %v401_v52  ;;  %v1006_v4 = vmul.f32 %v1965_v58, %v970_v24 }
  0xb6   : > { %v1137_v8 = vadd.f32 %v1105_v15, %v1037_v12  ;;  %v937_v28 = vadd.f32 %v905_v22, %v837_v47  ;;  %v1106_v31 = vmul.f32 %v1970_v62, %v1921_v18  ;;  %v906_v16 = vmul.f32 %v1169_v56, %v1961_v51 }
  0xb7   : > { %v738_v48 = vadd.f32 %v706_v1, %v638_v5  ;;  %v539_v59 = vadd.f32 %v507_v61, %v439_v37  ;;  %v607_v34 = vmul.f32 %v1168_v6, %v1950_v43  ;;  %v402_v14 = vmul.f32 %v969_v54, %v1946_v41  ;;  %v973_v61 = vld [vmem:[#allocation2 + $0xf0] sm:$0xff] }
  0xb8   : > { %v1237_v45 = vadd.f32 %v1205_v36, %v1137_v8  ;;  %v1038_v30 = vadd.f32 %v1006_v4, %v937_v28  ;;  %v508_v21 = vmul.f32 %v1948_v42, %v1915_v17  ;;  %v707_v35 = vmul.f32 %v970_v24, %v1959_v50  ;;  %v1073_v28 = vld [vmem:[#allocation2 + $0xf1] sm:$0xff]  ;;  %v773_v4 = vld [vmem:[#allocation2 + $0xe1] sm:$0xff] }
  0xb9   : > { %v838_v13 = vadd.f32 %v806_v10, %v738_v48  ;;  %v639_v33 = vadd.f32 %v607_v34, %v539_v59  ;;  %v807_v55 = vmul.f32 %v1968_v60, %v1921_v18  ;;  %v1206_v6 = vmul.f32 %v1972_v63, %v1170_v49  ;;  %v972_v18 = vld [vmem:[#allocation2 + $0xe0] sm:$0xff] }
  0xba   : > { %1269 = vst [vmem:[%s2033_s24 + $0x60] sm:$0xff] %v1237_v45  ;;  %v1138_v11 = vadd.f32 %v1106_v31, %v1038_v30  ;;  %v1007_v27 = vmul.f32 %v1965_v58, %v971_v53  ;;  %v440_v0 = vadd.f32 %v1955_v44, %v402_v14  ;;  %v1107_v17 = vmul.f32 %v1970_v62, %v1924_v19  ;;  %v474_v10 = vld [vmem:[#allocation2 + $0xd9] sm:$0xff] }
  0xbb   : > { %v938_v54 = vadd.f32 %v906_v16, %v838_v13  ;;  %v1207_v23 = vmul.f32 %v1972_v63, %v2186_v57  ;;  %v739_v40 = vadd.f32 %v707_v35, %v639_v33  ;;  %v608_v32 = vmul.f32 %v1169_v56, %v1950_v43  ;;  %v1173_v45 = vld [vmem:[#allocation2 + $0xf2] sm:$0xff] }
  0xbc   : > { %v1238_v7 = vadd.f32 %v1206_v6, %v1138_v11  ;;  %v540_v29 = vadd.f32 %v508_v21, %v440_v0  ;;  %v403_v2 = vmul.f32 %v970_v24, %v1946_v41  ;;  %v907_v15 = vmul.f32 %v1170_v49, %v1961_v51  ;;  %v1074_v11 = vld [vmem:[#allocation2 + $0xf9] sm:$0xff] }
  0xbd   : > { %v1039_v26 = vadd.f32 %v1007_v27, %v938_v54  ;;  %v839_v3 = vadd.f32 %v807_v55, %v739_v40  ;;  %v708_v36 = vmul.f32 %v971_v53, %v1959_v50  ;;  %v808_v25 = vmul.f32 %v1968_v60, %v1924_v19  ;;  %v974_v55 = vld [vmem:[#allocation2 + $0xf8] sm:$0xff] }
  0xbe   : > { %1270 = vst [vmem:[%s2033_s24 + $0x68] sm:$0xff] %v1238_v7  ;;  %v640_v38 = vadd.f32 %v608_v32, %v540_v29  ;;  %v441_v46 = vadd.f32 %v1955_v44, %v403_v2  ;;  %v509_v52 = vmul.f32 %v1948_v42, %v473_v9  ;;  %v1008_v24 = vmul.f32 %v1965_v58, %v972_v18  ;;  %v1174_v9 = vld [vmem:[#allocation2 + $0xfa] sm:$0xff] }
  0xbf   : > { %v1139_v12 = vadd.f32 %v1107_v17, %v1039_v26  ;;  %v939_v56 = vadd.f32 %v907_v15, %v839_v3  ;;  %v1108_v47 = vmul.f32 %v1970_v62, %v1927_v20  ;;  %v609_v1 = vmul.f32 %v1170_v49, %v1950_v43 }
  0xc0   : > { %v740_v22 = vadd.f32 %v708_v36, %v640_v38  ;;  %v541_v5 = vadd.f32 %v509_v52, %v441_v46  ;;  %v1208_v8 = vmul.f32 %v1972_v63, %v1172_v39  ;;  %v404_v31 = vmul.f32 %v971_v53, %v1946_v41  ;;  %v975_v38 = vld [vmem:[#allocation2 + $0x108] sm:$0xff] }
  0xc1   : > { %v1239_v37 = vadd.f32 %v1207_v23, %v1139_v12  ;;  %v1040_v19 = vadd.f32 %v1008_v24, %v939_v56  ;;  %v908_v16 = vmul.f32 %v2186_v57, %v1961_v51  ;;  %v709_v59 = vmul.f32 %v972_v18, %v1959_v50  ;;  %v1075_v24 = vld [vmem:[#allocation2 + $0x109] sm:$0xff] }
  0xc2   : > { %v840_v48 = vadd.f32 %v808_v25, %v740_v22  ;;  %v641_v20 = vadd.f32 %v609_v1, %v541_v5  ;;  %v1009_v49 = vmul.f32 %v1965_v58, %v973_v61  ;;  %v442_v30 = vadd.f32 %v1955_v44, %v404_v31 }
  0xc3   : > { %1271 = vst [vmem:[%s2033_s24 + $0x70] sm:$0xff] %v1239_v37  ;;  %v1140_v34 = vadd.f32 %v1108_v47, %v1040_v19  ;;  %v510_v14 = vmul.f32 %v1948_v42, %v474_v10  ;;  %v1109_v53 = vmul.f32 %v1970_v62, %v1073_v28  ;;  %v809_v33 = vmul.f32 %v1968_v60, %v773_v4 }
  0xc4   : > { %v940_v21 = vadd.f32 %v908_v16, %v840_v48  ;;  %v741_v13 = vadd.f32 %v709_v59, %v641_v20  ;;  %v610_v27 = vmul.f32 %v2186_v57, %v1950_v43  ;;  %v405_v0 = vmul.f32 %v972_v18, %v1946_v41  ;;  %v976_v59 = vld [vmem:[#allocation2 + $0x110] sm:$0xff] }
  0xc5   : > { %v1240_v35 = vadd.f32 %v1208_v8, %v1140_v34  ;;  %v542_v6 = vadd.f32 %v510_v14, %v442_v30  ;;  %v1209_v17 = vmul.f32 %v1972_v63, %v1173_v45  ;;  %v909_v40 = vmul.f32 %v1172_v39, %v1961_v51  ;;  %v1175_v8 = vld [vmem:[#allocation2 + $0x10a] sm:$0xff] }
  0xc6   : > { %v1041_v54 = vadd.f32 %v1009_v49, %v940_v21  ;;  %v841_v23 = vadd.f32 %v809_v33, %v741_v13  ;;  %v710_v29 = vmul.f32 %v973_v61, %v1959_v50  ;;  %v443_v32 = vadd.f32 %v1955_v44, %v405_v0  ;;  %v1076_v34 = vld [vmem:[#allocation2 + $0x111] sm:$0xff] }
  0xc7   : > { %1272 = vst [vmem:[%s2033_s24 + $0x78] sm:$0xff] %v1240_v35  ;;  %v642_v7 = vadd.f32 %v610_v27, %v542_v6  ;;  %v511_v2 = vmul.f32 %v773_v4, %v1948_v42  ;;  %v1010_v57 = vmul.f32 %v1965_v58, %v974_v55  ;;  %v1110_v18 = vmul.f32 %v1970_v62, %v1074_v11  ;;  %v1176_v33 = vld [vmem:[#allocation2 + $0x112] sm:$0xff] }
  0xc8   : > { %v1141_v26 = vadd.f32 %v1109_v53, %v1041_v54  ;;  %v941_v3 = vadd.f32 %v909_v40, %v841_v23  ;;  %v810_v36 = vmul.f32 %v1073_v28, %v1968_v60  ;;  %v611_v46 = vmul.f32 %v1172_v39, %v1950_v43 }
  0xc9   : > { %v742_v15 = vadd.f32 %v710_v29, %v642_v7  ;;  %v543_v25 = vadd.f32 %v511_v2, %v443_v32  ;;  %v1210_v56 = vmul.f32 %v1972_v63, %v1174_v9  ;;  %v406_v47 = vmul.f32 %v973_v61, %v1946_v41  ;;  %v977_v7 = vld [vmem:[#allocation2 + $0x120] sm:$0xff] }
  0xca   : > { %v1241_v52 = vadd.f32 %v1209_v17, %v1141_v26  ;;  %v1042_v12 = vadd.f32 %v1010_v57, %v941_v3  ;;  %v910_v5 = vmul.f32 %v1173_v45, %v1961_v51  ;;  %v711_v10 = vmul.f32 %v974_v55, %v1959_v50  ;;  %v1077_v57 = vld [vmem:[#allocation2 + $0x121] sm:$0xff] }
  0xcb   : > { %v842_v22 = vadd.f32 %v810_v36, %v742_v15  ;;  %v643_v1 = vadd.f32 %v611_v46, %v543_v25  ;;  %v1011_v19 = vmul.f32 %v1965_v58, %v975_v38  ;;  %v444_v39 = vadd.f32 %v1955_v44, %v406_v47 }
  0xcc   : > { %1273 = vst [vmem:[%s2033_s24 + $0x80] sm:$0xff] %v1241_v52  ;;  %v1142_v37 = vadd.f32 %v1110_v18, %v1042_v12  ;;  %v512_v4 = vmul.f32 %v1073_v28, %v1948_v42  ;;  %v1111_v48 = vmul.f32 %v1970_v62, %v1075_v24  ;;  %v811_v16 = vmul.f32 %v1074_v11, %v1968_v60  ;;  %v1177_v12 = vld [vmem:[#allocation2 + $0x122] sm:$0xff] }
  0xcd   : > { %v942_v31 = vadd.f32 %v910_v5, %v842_v22  ;;  %v743_v61 = vadd.f32 %v711_v10, %v643_v1  ;;  %v612_v30 = vmul.f32 %v1173_v45, %v1950_v43  ;;  %v407_v14 = vmul.f32 %v974_v55, %v1946_v41  ;;  %v978_v10 = vld [vmem:[#allocation2 + $0x128] sm:$0xff] }
  0xce   : > { %v1242_v20 = vadd.f32 %v1210_v56, %v1142_v37  ;;  %v544_v49 = vadd.f32 %v512_v4, %v444_v39  ;;  %v1211_v53 = vmul.f32 %v1972_v63, %v1175_v8  ;;  %v911_v28 = vmul.f32 %v1174_v9, %v1961_v51  ;;  %v1078_v37 = vld [vmem:[#allocation2 + $0x129] sm:$0xff] }
  0xcf   : > { %v1043_v21 = vadd.f32 %v1011_v19, %v942_v31  ;;  %v843_v13 = vadd.f32 %v811_v16, %v743_v61  ;;  %v712_v6 = vmul.f32 %v975_v38, %v1959_v50  ;;  %v445_v27 = vadd.f32 %v1955_v44, %v407_v14  ;;  %v1178_v16 = vld [vmem:[#allocation2 + $0x12a] sm:$0xff] }
  0xd0   : > { %1274 = vst [vmem:[%s2033_s24 + $0x88] sm:$0xff] %v1242_v20  ;;  %v644_v35 = vadd.f32 %v612_v30, %v544_v49  ;;  %v513_v0 = vmul.f32 %v1074_v11, %v1948_v42  ;;  %v1012_v45 = vmul.f32 %v1965_v58, %v976_v59  ;;  %v1112_v55 = vmul.f32 %v1970_v62, %v1076_v34 }
  0xd1   : > { %v1143_v54 = vadd.f32 %v1111_v48, %v1043_v21  ;;  %v943_v17 = vadd.f32 %v911_v28, %v843_v13  ;;  %v812_v40 = vmul.f32 %v1075_v24, %v1968_v60  ;;  %v613_v32 = vmul.f32 %v1174_v9, %v1950_v43 }
  0xd2   : > { %v744_v23 = vadd.f32 %v712_v6, %v644_v35  ;;  %v545_v29 = vadd.f32 %v513_v0, %v445_v27  ;;  %v1212_v3 = vmul.f32 %v1972_v63, %v1176_v33  ;;  %v408_v11 = vmul.f32 %v975_v38, %v1946_v41  ;;  %v979_v35 = vld [vmem:[#allocation2 + $0x138] sm:$0xff] }
  0xd3   : > { %v1243_v2 = vadd.f32 %v1211_v53, %v1143_v54  ;;  %v1044_v26 = vadd.f32 %v1012_v45, %v943_v17  ;;  %v912_v15 = vmul.f32 %v1175_v8, %v1961_v51  ;;  %v713_v25 = vmul.f32 %v976_v59, %v1959_v50  ;;  %v1079_v45 = vld [vmem:[#allocation2 + $0x139] sm:$0xff] }
  0xd4   : > { %v844_v18 = vadd.f32 %v812_v40, %v744_v23  ;;  %v645_v36 = vadd.f32 %v613_v32, %v545_v29  ;;  %v1013_v52 = vmul.f32 %v1965_v58, %v977_v7  ;;  %v446_v9 = vadd.f32 %v1955_v44, %v408_v11 }
  0xd5   : > { %1275 = vst [vmem:[%s2033_s24 + $0x90] sm:$0xff] %v1243_v2  ;;  %v1144_v46 = vadd.f32 %v1112_v55, %v1044_v26  ;;  %v514_v56 = vmul.f32 %v1075_v24, %v1948_v42  ;;  %v1113_v22 = vmul.f32 %v1970_v62, %v1077_v57  ;;  %v813_v5 = vmul.f32 %v1076_v34, %v1968_v60  ;;  %v1179_v26 = vld [vmem:[#allocation2 + $0x13a] sm:$0xff] }
  0xd6   : > { %v944_v47 = vadd.f32 %v912_v15, %v844_v18  ;;  %v745_v38 = vadd.f32 %v713_v25, %v645_v36  ;;  %v614_v39 = vmul.f32 %v1175_v8, %v1950_v43  ;;  %v409_v4 = vmul.f32 %v976_v59, %v1946_v41  ;;  %v980_v25 = vld [vmem:[#allocation2 + $0x140] sm:$0xff] }
  0xd7   : > { %v1244_v1 = vadd.f32 %v1212_v3, %v1144_v46  ;;  %v546_v19 = vadd.f32 %v514_v56, %v446_v9  ;;  %v1213_v48 = vmul.f32 %v1972_v63, %v1177_v12  ;;  %v913_v24 = vmul.f32 %v1176_v33, %v1961_v51  ;;  %v1080_v46 = vld [vmem:[#allocation2 + $0x141] sm:$0xff] }
  0xd8   : > { %v1045_v31 = vadd.f32 %v1013_v52, %v944_v47  ;;  %v845_v61 = vadd.f32 %v813_v5, %v745_v38  ;;  %v714_v49 = vmul.f32 %v977_v7, %v1959_v50  ;;  %v447_v30 = vadd.f32 %v1955_v44, %v409_v4  ;;  %v1180_v38 = vld [vmem:[#allocation2 + $0x142] sm:$0xff] }
  0xd9   : > { %1276 = vst [vmem:[%s2033_s24 + $0x98] sm:$0xff] %v1244_v1  ;;  %v646_v20 = vadd.f32 %v614_v39, %v546_v19  ;;  %v515_v14 = vmul.f32 %v1076_v34, %v1948_v42  ;;  %v1014_v8 = vmul.f32 %v1965_v58, %v978_v10  ;;  %v1114_v59 = vmul.f32 %v1970_v62, %v1078_v37  ;;  %v2302_v19 = vld [vmem:[%s2448_s2] ss:$0 sm:$0xff] }
  0xda   : > { %v1145_v21 = vadd.f32 %v1113_v22, %v1045_v31  ;;  %v945_v53 = vadd.f32 %v913_v24, %v845_v61  ;;  %v814_v28 = vmul.f32 %v1077_v57, %v1968_v60  ;;  %v615_v27 = vmul.f32 %v1176_v33, %v1950_v43 }
  0xdb   : > { %v746_v13 = vadd.f32 %v714_v49, %v646_v20  ;;  %v547_v6 = vadd.f32 %v515_v14, %v447_v30  ;;  %v1214_v17 = vmul.f32 %v1972_v63, %v1178_v16  ;;  %v410_v34 = vmul.f32 %v977_v7, %v1946_v41  ;;  %v981_v20 = vld [vmem:[#allocation2 + $0x150] sm:$0xff] }
  0xdc   : > { %v1245_v0 = vadd.f32 %v1213_v48, %v1145_v21  ;;  %v1046_v54 = vadd.f32 %v1014_v8, %v945_v53  ;;  %v914_v23 = vmul.f32 %v1177_v12, %v1961_v51  ;;  %v715_v29 = vmul.f32 %v978_v10, %v1959_v50  ;;  %v1081_v8 = vld [vmem:[#allocation2 + $0x151] sm:$0xff] }
  0xdd   : > { %v846_v55 = vadd.f32 %v814_v28, %v746_v13  ;;  %v647_v40 = vadd.f32 %v615_v27, %v547_v6  ;;  %v1015_v2 = vmul.f32 %v1965_v58, %v979_v35  ;;  %v448_v33 = vadd.f32 %v1955_v44, %v410_v34 }
  0xde   : > { %1277 = vst [vmem:[%s2033_s24 + $0xa0] sm:$0xff] %v1245_v0  ;;  %v1146_v32 = vadd.f32 %v1114_v59, %v1046_v54  ;;  %v516_v3 = vmul.f32 %v1077_v57, %v1948_v42  ;;  %v1115_v18 = vmul.f32 %v1970_v62, %v1079_v45  ;;  %v815_v15 = vmul.f32 %v1078_v37, %v1968_v60  ;;  %v1181_v54 = vld [vmem:[#allocation2 + $0x152] sm:$0xff] }
  0xdf   : > { %v946_v11 = vadd.f32 %v914_v23, %v846_v55  ;;  %v747_v7 = vadd.f32 %v715_v29, %v647_v40  ;;  %v616_v9 = vmul.f32 %v1177_v12, %v1950_v43  ;;  %v411_v56 = vmul.f32 %v978_v10, %v1946_v41  ;;  %v982_v29 = vld [vmem:[#allocation2 + $0x158] sm:$0xff] }
  0xe0   : > { %v1246_v36 = vadd.f32 %v1214_v17, %v1146_v32  ;;  %v548_v52 = vadd.f32 %v516_v3, %v448_v33  ;;  %v1215_v44 = vmul.f32 %v1972_v63, %v1179_v26  ;;  %v915_v57 = vmul.f32 %v1178_v16, %v1961_v51  ;;  %v1082_v32 = vld [vmem:[#allocation2 + $0x159] sm:$0xff] }
  0xe1   : > { %v1047_v47 = vadd.f32 %v1015_v2, %v946_v11  ;;  %v847_v22 = vadd.f32 %v815_v15, %v747_v7  ;;  %v716_v1 = vmul.f32 %v979_v35, %v1959_v50  ;;  %v449_v12 = vadd.f32 %v2302_v19, %v411_v56  ;;  %v1182_v15 = vld [vmem:[#allocation2 + $0x15a] sm:$0xff] }
  0xe2   : > { %1278 = vst [vmem:[%s2033_s24 + $0xa8] sm:$0xff] %v1246_v36  ;;  %v648_v5 = vadd.f32 %v616_v9, %v548_v52  ;;  %v517_v10 = vmul.f32 %v1078_v37, %v1948_v42  ;;  %v1016_v31 = vmul.f32 %v1965_v58, %v980_v25  ;;  %v1116_v48 = vmul.f32 %v1970_v62, %v1080_v46 }
  0xe3   : > { %v1147_v39 = vadd.f32 %v1115_v18, %v1047_v47  ;;  %v947_v4 = vadd.f32 %v915_v57, %v847_v22  ;;  %v816_v24 = vmul.f32 %v1079_v45, %v1968_v60  ;;  %v617_v30 = vmul.f32 %v1178_v16, %v1950_v43 }
  0xe4   : > { %v748_v61 = vadd.f32 %v716_v1, %v648_v5  ;;  %v549_v49 = vadd.f32 %v517_v10, %v449_v12  ;;  %v1216_v53 = vmul.f32 %v1972_v63, %v1180_v38  ;;  %v412_v37 = vmul.f32 %v979_v35, %v1946_v41  ;;  %v983_v5 = vld [vmem:[#allocation2 + $0x168] sm:$0xff] }
  0xe5   : > { %v1247_v14 = vadd.f32 %v1215_v44, %v1147_v39  ;;  %v1048_v21 = vadd.f32 %v1016_v31, %v947_v4  ;;  %v916_v13 = vmul.f32 %v1179_v26, %v1961_v51  ;;  %v717_v6 = vmul.f32 %v980_v25, %v1959_v50  ;;  %v1083_v31 = vld [vmem:[#allocation2 + $0x169] sm:$0xff] }
  0xe6   : > { %v848_v59 = vadd.f32 %v816_v24, %v748_v61  ;;  %v649_v28 = vadd.f32 %v617_v30, %v549_v49  ;;  %v1017_v0 = vmul.f32 %v1965_v58, %v981_v20  ;;  %v450_v16 = vadd.f32 %v2302_v19, %v412_v37 }
  0xe7   : > { %1279 = vst [vmem:[%s2033_s24 + $0xb0] sm:$0xff] %v1247_v14  ;;  %v1148_v27 = vadd.f32 %v1116_v48, %v1048_v21  ;;  %v518_v17 = vmul.f32 %v1079_v45, %v1948_v42  ;;  %v1117_v55 = vmul.f32 %v1970_v62, %v1081_v8  ;;  %v817_v23 = vmul.f32 %v1080_v46, %v1968_v60  ;;  %v1183_v21 = vld [vmem:[#allocation2 + $0x16a] sm:$0xff] }
  0xe8   : > { %v948_v34 = vadd.f32 %v916_v13, %v848_v59  ;;  %v749_v35 = vadd.f32 %v717_v6, %v649_v28  ;;  %v618_v33 = vmul.f32 %v1179_v26, %v1950_v43  ;;  %v413_v3 = vmul.f32 %v980_v25, %v1946_v41  ;;  %v984_v6 = vld [vmem:[#allocation2 + $0x170] sm:$0xff] }
  0xe9   : > { %v1248_v40 = vadd.f32 %v1216_v53, %v1148_v27  ;;  %v550_v2 = vadd.f32 %v518_v17, %v450_v16  ;;  %v1217_v18 = vmul.f32 %v1972_v63, %v1181_v54  ;;  %v917_v45 = vmul.f32 %v1180_v38, %v1961_v51  ;;  %v1084_v27 = vld [vmem:[#allocation2 + $0x171] sm:$0xff] }
  0xea   : > { %v1049_v11 = vadd.f32 %v1017_v0, %v948_v34  ;;  %v849_v7 = vadd.f32 %v817_v23, %v749_v35  ;;  %v718_v52 = vmul.f32 %v981_v20, %v1959_v50  ;;  %v451_v9 = vadd.f32 %v2302_v19, %v413_v3  ;;  %v1184_v23 = vld [vmem:[#allocation2 + $0x172] sm:$0xff] }
  0xeb   : > { %1280 = vst [vmem:[%s2033_s24 + $0xb8] sm:$0xff] %v1248_v40  ;;  %v650_v36 = vadd.f32 %v618_v33, %v550_v2  ;;  %v519_v56 = vmul.f32 %v1080_v46, %v1948_v42  ;;  %v1018_v26 = vmul.f32 %v1965_v58, %v982_v29  ;;  %v1118_v25 = vmul.f32 %v1970_v62, %v1082_v32 }
  0xec   : > { %v1149_v47 = vadd.f32 %v1117_v55, %v1049_v11  ;;  %v949_v44 = vadd.f32 %v917_v45, %v849_v7  ;;  %v818_v57 = vmul.f32 %v1081_v8, %v1968_v60  ;;  %v619_v12 = vmul.f32 %v1180_v38, %v1950_v43 }
  0xed   : > { %v750_v22 = vadd.f32 %v718_v52, %v650_v36  ;;  %v551_v1 = vadd.f32 %v519_v56, %v451_v9  ;;  %v1218_v4 = vmul.f32 %v1972_v63, %v1182_v15  ;;  %v414_v46 = vmul.f32 %v981_v20, %v1946_v41  ;;  %v985_v36 = vld [vmem:[#allocation2 + $0x180] sm:$0xff] }
  0xee   : > { %v1249_v10 = vadd.f32 %v1217_v18, %v1149_v47  ;;  %v1050_v39 = vadd.f32 %v1018_v26, %v949_v44  ;;  %v918_v61 = vmul.f32 %v1181_v54, %v1961_v51  ;;  %v719_v49 = vmul.f32 %v982_v29, %v1959_v50 }
  0xef   : > { %v850_v48 = vadd.f32 %v818_v57, %v750_v22  ;;  %v651_v24 = vadd.f32 %v619_v12, %v551_v1  ;;  %v1019_v14 = vmul.f32 %v1965_v58, %v983_v5  ;;  %v452_v38 = vadd.f32 %v2302_v19, %v414_v46  ;;  %v1185_v46 = vld [vmem:[#allocation2 + $0x182] sm:$0xff] }
  0xf0   : > { %1281 = vst [vmem:[%s2033_s24 + $0xc0] sm:$0xff] %v1249_v10  ;;  %v1150_v30 = vadd.f32 %v1118_v25, %v1050_v39  ;;  %v520_v53 = vmul.f32 %v1081_v8, %v1948_v42  ;;  %v1119_v59 = vmul.f32 %v1970_v62, %v1083_v31  ;;  %v819_v13 = vmul.f32 %v1082_v32, %v1968_v60  ;;  %v1085_v10 = vld [vmem:[#allocation2 + $0x181] sm:$0xff] }
  0xf1   : > { %v950_v37 = vadd.f32 %v918_v61, %v850_v48  ;;  %v751_v20 = vadd.f32 %v719_v49, %v651_v24  ;;  %v620_v16 = vmul.f32 %v1181_v54, %v1950_v43  ;;  %v415_v17 = vmul.f32 %v982_v29, %v1946_v41  ;;  %v986_v49 = vld [vmem:[#allocation2 + $0x188] sm:$0xff] }
  0xf2   : > { %v1250_v28 = vadd.f32 %v1218_v4, %v1150_v30  ;;  %v552_v0 = vadd.f32 %v520_v53, %v452_v38  ;;  %v1219_v55 = vmul.f32 %v1972_v63, %v1183_v21  ;;  %v919_v8 = vmul.f32 %v1182_v15, %v1961_v51 }
  0xf3   : > { %v1051_v34 = vadd.f32 %v1019_v14, %v950_v37  ;;  %v851_v35 = vadd.f32 %v819_v13, %v751_v20  ;;  %v720_v2 = vmul.f32 %v983_v5, %v1959_v50  ;;  %v453_v33 = vadd.f32 %v2302_v19, %v415_v17  ;;  %v1086_v13 = vld [vmem:[#allocation2 + $0x189] sm:$0xff] }
  0xf4   : > { %1282 = vst [vmem:[%s2033_s24 + $0xc8] sm:$0xff] %v1250_v28  ;;  %v652_v40 = vadd.f32 %v620_v16, %v552_v0  ;;  %v521_v3 = vmul.f32 %v1082_v32, %v1948_v42  ;;  %v1020_v54 = vmul.f32 %v1965_v58, %v984_v6  ;;  %v1120_v29 = vmul.f32 %v1970_v62, %v1084_v27 }
  0xf5   : > { %v1151_v11 = vadd.f32 %v1119_v59, %v1051_v34  ;;  %v951_v18 = vadd.f32 %v919_v8, %v851_v35  ;;  %v820_v45 = vmul.f32 %v1083_v31, %v1968_v60  ;;  %v621_v9 = vmul.f32 %v1182_v15, %v1950_v43 }
  0xf6   : > { %v752_v7 = vadd.f32 %v720_v2, %v652_v40  ;;  %v553_v52 = vadd.f32 %v521_v3, %v453_v33  ;;  %v1220_v44 = vmul.f32 %v1972_v63, %v1184_v23  ;;  %v416_v32 = vmul.f32 %v983_v5, %v1946_v41  ;;  %v1087_v3 = vld [vmem:[#allocation2 + $0x199] sm:$0xff] }
  0xf7   : > { %v1251_v56 = vadd.f32 %v1219_v55, %v1151_v11  ;;  %v1052_v47 = vadd.f32 %v1020_v54, %v951_v18  ;;  %v920_v25 = vmul.f32 %v1183_v21, %v1961_v51  ;;  %v721_v57 = vmul.f32 %v984_v6, %v1959_v50  ;;  %v1515_v11 = vld [vmem:[#allocation2] sm:$0xff] }
  0xf8   : > { %v852_v26 = vadd.f32 %v820_v45, %v752_v7  ;;  %v653_v22 = vadd.f32 %v621_v9, %v553_v52  ;;  %v1021_v12 = vmul.f32 %v1965_v58, %v985_v36  ;;  %v454_v39 = vadd.f32 %v2302_v19, %v416_v32  ;;  %v1187_v52 = vld [vmem:[#allocation2 + $0x19a] sm:$0xff] }
  0xf9   : > { %1283 = vst [vmem:[%s2033_s24 + $0xd0] sm:$0xff] %v1251_v56  ;;  %v1152_v1 = vadd.f32 %v1120_v29, %v1052_v47  ;;  %v522_v15 = vmul.f32 %v1083_v31, %v1948_v42  ;;  %v821_v5 = vmul.f32 %v1084_v27, %v1968_v60  ;;  %v622_v61 = vmul.f32 %v1183_v21, %v1950_v43  ;;  %v1088_v9 = vld [vmem:[#allocation2 + $0x1a1] sm:$0xff] }
  0xfa   : > { %v952_v4 = vadd.f32 %v920_v25, %v852_v26  ;;  %v753_v48 = vadd.f32 %v721_v57, %v653_v22  ;;  %v722_v14 = vmul.f32 %v985_v36, %v1959_v50  ;;  %v417_v38 = vmul.f32 %v984_v6, %v1946_v41  ;;  %v1186_v6 = vld [vmem:[#allocation2 + $0x18a] sm:$0xff] }
  0xfb   : > { %v1252_v24 = vadd.f32 %v1220_v44, %v1152_v1  ;;  %v554_v30 = vadd.f32 %v522_v15, %v454_v39  ;;  %v1121_v37 = vmul.f32 %v1970_v62, %v1085_v10  ;;  %v921_v31 = vmul.f32 %v1184_v23, %v1961_v51 }
  0xfc   : > { %v1053_v53 = vadd.f32 %v1021_v12, %v952_v4  ;;  %v853_v59 = vadd.f32 %v821_v5, %v753_v48  ;;  %v1221_v20 = vmul.f32 %v1972_v63, %v1185_v46  ;;  %v455_v21 = vadd.f32 %v2302_v19, %v417_v38 }
  0xfd   : > { %1284 = vst [vmem:[%s2033_s24 + $0xd8] sm:$0xff] %v1252_v24  ;;  %v654_v28 = vadd.f32 %v622_v61, %v554_v30  ;;  %v523_v0 = vmul.f32 %v1084_v27, %v1948_v42  ;;  %v1022_v34 = vmul.f32 %v1965_v58, %v986_v49  ;;  %v822_v41 = vmul.f32 %v1085_v10, %v1968_v60 }
  0xfe   : > { %v1153_v16 = vadd.f32 %v1121_v37, %v1053_v53  ;;  %v953_v17 = vadd.f32 %v921_v31, %v853_v59  ;;  %v623_v8 = vmul.f32 %v1184_v23, %v1950_v43  ;;  %v723_v40 = vmul.f32 %v986_v49, %v1959_v50 }
  0xff   : > { %v754_v55 = vadd.f32 %v722_v14, %v654_v28  ;;  %v555_v35 = vadd.f32 %v523_v0, %v455_v21  ;;  %v1122_v19 = vmul.f32 %v1970_v62, %v1086_v13  ;;  %v922_v27 = vmul.f32 %v1185_v46, %v1961_v51 }
 0x100   : > { %v1253_v2 = vadd.f32 %v1221_v20, %v1153_v16  ;;  %v1054_v33 = vadd.f32 %v1022_v34, %v953_v17  ;;  %v1023_v18 = vmul.f32 %v1515_v11, %v1965_v58  ;;  %v1222_v7 = vmul.f32 %v1972_v63, %v1186_v6 }
 0x101   : > { %v854_v42 = vadd.f32 %v822_v41, %v754_v55  ;;  %v655_v54 = vadd.f32 %v623_v8, %v555_v35  ;;  %v1123_v50 = vmul.f32 %v1970_v62, %v1087_v3  ;;  %v823_v45 = vmul.f32 %v1086_v13, %v1968_v60  ;;  %v1188_v60 = vld [vmem:[#allocation2 + $0x1a2] sm:$0xff] }
 0x102   : > { %1285 = vst [vmem:[%s2033_s24 + $0xe0] sm:$0xff] %v1253_v2  ;;  %v1154_v29 = vadd.f32 %v1122_v19, %v1054_v33  ;;  %v923_v58 = vmul.f32 %v1186_v6, %v1961_v51  ;;  %v1223_v32 = vmul.f32 %v1972_v63, %v1187_v52  ;;  %v1124_v25 = vmul.f32 %v1970_v62, %v1088_v9 }
 0x103   : > { %v954_v43 = vadd.f32 %v922_v27, %v854_v42  ;;  %v755_v23 = vadd.f32 %v723_v40, %v655_v54  ;;  %v1224_v12 = vmul.f32 %v1972_v63, %v1188_v60 }
 0x104   : > { %v1254_v36 = vadd.f32 %v1222_v7, %v1154_v29 }
 0x105   : > { %v1055_v56 = vadd.f32 %v1023_v18, %v954_v43  ;;  %v855_v47 = vadd.f32 %v823_v45, %v755_v23 }
 0x106   : > { %1286 = vst [vmem:[%s2033_s24 + $0xe8] sm:$0xff] %v1254_v36 }
 0x107   : > { %v1155_v44 = vadd.f32 %v1123_v50, %v1055_v56  ;;  %v955_v26 = vadd.f32 %v923_v58, %v855_v47 }
 0x109   : > { %v1255_v22 = vadd.f32 %v1223_v32, %v1155_v44  ;;  %v1056_v57 = vadd.f32 %v1023_v18, %v955_v26 }
 0x10b   : > { %1287 = vst [vmem:[%s2033_s24 + $0xf0] sm:$0xff] %v1255_v22  ;;  %v1156_v1 = vadd.f32 %v1124_v25, %v1056_v57 }
 0x10d   : > { %v1256_v51 = vadd.f32 %v1224_v12, %v1156_v1 }
 0x10f   : > { %1288 = vst [vmem:[%s2033_s24 + $0xf8] sm:$0xff] %v1256_v51 }
 0x110   : > { %1587 = shalt.err (!%p1584_p5)
}
 0x111   : > { %s1588_s4 = scalar_lea.hbm %s2394_s8, 4096  ;;  %s1592_s22 = scalar_lea.hbm %s2449_s3, 8192 }
 0x112   : > { %p1589_p9 = scmp.ne.s32.totalorder %s2394_s8, %s1588_s4  ;;  %p1593_p3 = scmp.lt.u32.totalorder %s2394_s8, %s2449_s3 }
 0x113   : > { %p1594_p7 = scmp.lt.u32.totalorder %s1592_s22, %s1588_s4  ;;  %p1596_p4 = scmp.lt.u32.totalorder %s1588_s4, %s2394_s8 }
 0x114   : > { %p1590_p1 = pnand %p1589_p9, %p1788_p10 }
 0x115   : > { %p1595_p13 = por %p1594_p7, %p1593_p3 }
 0x116   : > { %p1591_p2 = pneg %p1590_p1 }
 0x117   : > { %p1597_p6 = por %p1596_p4, %p1595_p13 }
 0x119   : > { %p1598_p8 = pnand %p1597_p6, %p1591_p2 }
 0x11b   : > { %1601 = shalt.err (!%p1598_p8)
}
 0x11c   : > { %s1670_s10 = smov 128   ;;  %s1671_s11 = smov 8  }
 0x11d   : > { %1440 = dma.vmem_to_hbm [thread:$0]  (%p1788_p10), %s2396_s18, 4096, %s2394_s8, %s1290_s21, %s1670_s10, %s1670_s10, %s1671_s11  }
 0x11e PF: > { %s1319_s26 = sand.u32 1, %s1640_s12   ;;  %p2467_p12 = scmp.ne.s32.totalorder %s2457_s23, 0 }
 0x11f   : > { %p2468_p11 = scmp.ge.s32.totalorder %s1660_s17, 2  ;;  %s1320_s7 = scalar_lea.sflag [#allocation5], %s1319_s26 }
 0x121   : > { %p1451_p0 = pnand %p2468_p11, %p2467_p12 }
 0x123   : > { %1635 = dma.done.wait (!%p1451_p0), %s1320_s7, 4096  }
 0x124   : > { %1637 = vsyncadd (!%p1451_p0), %s1320_s7, 4294963200  ;;  %s20_s17 = sadd.s32 1, %s1660_s17   ;;  %s2469_s12 = smov %s1644_s13 }
 0x125   : > { %p17_p5 = scmp.ge.s32.totalorder %s20_s17, 4   ;;  %s2470_s13 = smov %s1648_s14 }
 0x126   : > { %s2471_s14 = smov %s1797_s5  ;;  %s2472_s15 = smov %s1656_s16 }
 0x127   : > { %s2473_s16 = smov %s2475_s28  ;;  %19 = sbr.rel (!%p17_p5) target bundleno = 7 (0x7), region = 88 }
 0x12e   :  { %1325 = vsyncpa [#allocation4], 1 }
 0x12f   :  { %1327 = vsyncpa [#allocation4 + $0x1], 1 }
 0x130   :  { %1328 = vsyncpa [#allocation7], 1 }
 0x131   :  { %1329 = vsyncpa [#allocation5], 1 }
 0x132   :  { %1331 = vsyncpa [#allocation5 + $0x1], 1 }

</bundles_post_ra>
